<compile_context>
chip_gen: v7x
topology: tpu7x:2x2x1
jax: 0.10.0
libtpu: 0.0.40
codegen_flags: <defaults>
</compile_context>

<pallas_src>
from functools import partial

import jax
import jax.numpy as jnp
from jax.experimental import pallas as pl
from jax.experimental.pallas import tpu as pltpu


def _round_up(x, m):
    return ((x + m - 1) // m) * m


def _fin_layout(H, E, M, X, CP):
    """Row layout of the packed constant buffer (each block 8-sublane aligned)."""
    M2 = M // 2
    sizes = [
        ("ln_g", 1), ("ln_b", 1),
        ("elo_w1", E), ("elo_b1", 1), ("elo_w2", M), ("elo_b2", 1),
        ("f1_home", H), ("f1_away", H), ("f1_elo", M2), ("f1_xgb", X),
        ("f1_b", 1), ("f2_w", CP), ("f2_b", 1),
    ]
    offs, r = {}, 0
    for name, n in sizes:
        offs[name] = r
        r += _round_up(n, 8)
    return offs, r


# --------------------------- one-time param prep ---------------------------- #
def prepare_params(params):
    """Hoisted out of the per-call path: fuse/reorder/scale LSTM weights and
    pack all small constants into three lane-friendly buffers."""
    H = params["w_hh_h"].shape[0]
    D = params["w_ih_h"].shape[0]
    E = params["elo_w1"].shape[0]
    M = params["elo_w1"].shape[1]
    M2 = M // 2
    X = params["fin_w1"].shape[0] - 2 * H - M2
    NC = params["fin_w2"].shape[1]
    C_HID = params["fin_w1"].shape[1]
    CP = _round_up(C_HID, 128)
    NP = _round_up(NC, 128)
    W = max(CP, NP)
    assert 2 * H <= W and M <= W and E + X <= W

    def gate_cols(w):   # (R, 4H) in PyTorch gate order [i, f, g, o] -> blocks
        return w[:, 0:H], w[:, H:2 * H], w[:, 2 * H:3 * H], w[:, 3 * H:4 * H]

    # Fuse home/away block-diagonally; reorder gate columns to
    # [i_h, i_a, f_h, f_a, o_h, o_a, g_h, g_a] and fold the sigmoid 0.5 into
    # the i/f/o columns (sigmoid(x) = 0.5*(tanh(x/2)+1)).
    def fuse(w_home, w_away):
        ih, fh, gh, oh = gate_cols(w_home)
        ia, fa, ga, oa = gate_cols(w_away)
        Z = jnp.zeros_like(ih)
        top = jnp.concatenate([0.5 * ih, Z, 0.5 * fh, Z, 0.5 * oh, Z, gh, Z], axis=1)
        bot = jnp.concatenate([Z, 0.5 * ia, Z, 0.5 * fa, Z, 0.5 * oa, Z, ga], axis=1)
        return jnp.concatenate([top, bot], axis=0)            # (2R, 8H)

    w_ih_f = fuse(params["w_ih_h"], params["w_ih_a"])          # (2D, 8H) f32
    w_hh_f = fuse(params["w_hh_h"], params["w_hh_a"]).astype(jnp.bfloat16)  # (2H, 8H)

    bi_h, bf_h, bg_h, bo_h = gate_cols(params["b_h"])
    bi_a, bf_a, bg_a, bo_a = gate_cols(params["b_a"])
    b_f = jnp.concatenate(
        [0.5 * bi_h, 0.5 * bi_a, 0.5 * bf_h, 0.5 * bf_a,
         0.5 * bo_h, 0.5 * bo_a, bg_h, bg_a], axis=1)          # (1, 8H)

    proj_pack = jnp.concatenate([w_ih_f, b_f], axis=0)         # (2D+1, 8H) f32

    # Packed constant buffer: LayerNorm params, Elo MLP, final-layer blocks.
    offs, nrows = _fin_layout(H, E, M, X, CP)
    blocks = {
        "ln_g": jnp.concatenate([params["ln_h_g"], params["ln_a_g"]], axis=1),
        "ln_b": jnp.concatenate([params["ln_h_b"], params["ln_a_b"]], axis=1),
        "elo_w1": params["elo_w1"], "elo_b1": params["elo_b1"],
        "elo_w2": params["elo_w2"], "elo_b2": params["elo_b2"],
        "f1_home": params["fin_w1"][0:H],
        "f1_away": params["fin_w1"][H:2 * H],
        "f1_elo": params["fin_w1"][2 * H:2 * H + M2],
        "f1_xgb": params["fin_w1"][2 * H + M2:],
        "f1_b": params["fin_b1"],
        "f2_w": params["fin_w2"],      # (C_HID, NC); remaining rows/cols stay 0
        "f2_b": params["fin_b2"],
    }
    fin_pack = jnp.zeros((nrows, W), jnp.float32)
    for name, a in blocks.items():
        fin_pack = fin_pack.at[offs[name]:offs[name] + a.shape[0],
                               0:a.shape[1]].set(a.astype(jnp.float32))

    packed = {"proj": proj_pack, "w_hh": w_hh_f, "fin": fin_pack}
    dims = (H, E, M, X, NC)            # static ints for the jitted forward
    return packed, dims


# ------------------------------ forward ------------------------------------- #
@partial(jax.jit, static_argnames=("dims",))
def dual_lstm_forward(home_seq, away_seq, elo, xgb, packed, dims):
    """home_seq/away_seq: (B, T, D) batch-first (PyTorch convention)."""
    H, E, M, X, NC = dims
    B, T, D = home_seq.shape
    D2, H2, G, M2 = 2 * D, 2 * H, 8 * H, M // 2
    C_HID = (2 * H + M2 + X) // 2
    CP = _round_up(C_HID, 128)
    NP = _round_up(NC, 128)
    offs, _ = _fin_layout(H, E, M, X, CP)

    # Per-call data prep (tiny, fused by XLA into one small op before the kernel):
    # time-major fused feature matrix and packed [elo | xgb].
    x_tm = jnp.transpose(jnp.concatenate([home_seq, away_seq], axis=-1),
                         (1, 0, 2)).reshape(T * B, D2)          # (T*B, 2D)
    ex = jnp.concatenate([elo, xgb], axis=1)                    # (B, E+X)

    def kernel(x_ref, ex_ref, proj_ref, whh_ref, fin_ref, out_ref, xp_ref):
        # ---- preamble: hoisted input projection for all steps / both LSTMs ----
        # (MXU otherwise idle before the recurrence; 0.5 folded into i/f/o cols.)
        xp_ref[...] = (
            jnp.dot(x_ref[...], proj_ref[0:D2, :], preferred_element_type=jnp.float32)
            + proj_ref[D2:D2 + 1, :]
        )                                                        # (T*B, 8H)

        w_hh = whh_ref[...]             # (2H, 8H) bf16 MXU operand, loaded once

        def step(t, carry):
            h, c = carry                                        # f32 (B, 2H)
            row0 = pl.multiple_of(t * B, B)
            # Only the recurrent matmul stays on the serial chain (bf16 in, f32 acc).
            gates = xp_ref[pl.ds(row0, B), :] + jnp.dot(
                h.astype(jnp.bfloat16), w_hh, preferred_element_type=jnp.float32
            )                                                   # (B, 8H)
            # Single full-width tanh; recover i/f/o sigmoids as 0.5*(t+1) (VPU).
            tg = jnp.tanh(gates)
            ifo = 0.5 * (tg[:, 0:3 * H2] + 1.0)
            i_g = ifo[:, 0:H2]
            f_g = ifo[:, H2:2 * H2]
            o_g = ifo[:, 2 * H2:3 * H2]
            g_g = tg[:, 3 * H2:4 * H2]
            c_new = f_g * c + i_g * g_g
            h_new = o_g * jnp.tanh(c_new)
            return (h_new, c_new)

        h0 = jnp.zeros((B, H2), jnp.float32)
        c0 = jnp.zeros((B, H2), jnp.float32)
        h_last, _ = jax.lax.fori_loop(0, T, step, (h0, c0), unroll=True)

        def layer_norm(x, gamma, beta, eps=1e-5):
            mean = jnp.mean(x, axis=-1, keepdims=True)
            var = jnp.mean((x - mean) ** 2, axis=-1, keepdims=True)
            return (x - mean) * jax.lax.rsqrt(var + eps) * gamma + beta

        ln_g = fin_ref[offs["ln_g"]:offs["ln_g"] + 1, 0:H2]
        ln_b = fin_ref[offs["ln_b"]:offs["ln_b"] + 1, 0:H2]
        home_ln = layer_norm(h_last[:, 0:H], ln_g[:, 0:H], ln_b[:, 0:H])
        away_ln = layer_norm(h_last[:, H:H2], ln_g[:, H:H2], ln_b[:, H:H2])

        # Elo MLP (Linear -> ReLU -> [Dropout=id] -> Linear -> ReLU -> [Dropout=id]).
        elo_x = ex_ref[:, 0:E]
        xgb_x = ex_ref[:, E:E + X]
        e_w1 = fin_ref[offs["elo_w1"]:offs["elo_w1"] + E, 0:M]
        e_b1 = fin_ref[offs["elo_b1"]:offs["elo_b1"] + 1, 0:M]
        e_w2 = fin_ref[offs["elo_w2"]:offs["elo_w2"] + M, 0:M2]
        e_b2 = fin_ref[offs["elo_b2"]:offs["elo_b2"] + 1, 0:M2]
        e1 = jax.nn.relu(jnp.dot(elo_x, e_w1, preferred_element_type=jnp.float32) + e_b1)
        e2 = jax.nn.relu(jnp.dot(e1, e_w2, preferred_element_type=jnp.float32) + e_b2)

        # Final MLP: ragged concat replaced by partial matmuls against the
        # zero-padded row blocks of fin_w1 (ReLU keeps padded lanes at 0).
        f1_home = fin_ref[offs["f1_home"]:offs["f1_home"] + H, :]
        f1_away = fin_ref[offs["f1_away"]:offs["f1_away"] + H, :]
        f1_elo = fin_ref[offs["f1_elo"]:offs["f1_elo"] + M2, :]
        f1_xgb = fin_ref[offs["f1_xgb"]:offs["f1_xgb"] + X, :]
        f1_b = fin_ref[offs["f1_b"]:offs["f1_b"] + 1, :]
        z1 = jax.nn.relu(
            jnp.dot(home_ln, f1_home, preferred_element_type=jnp.float32)
            + jnp.dot(away_ln, f1_away, preferred_element_type=jnp.float32)
            + jnp.dot(e2, f1_elo, preferred_element_type=jnp.float32)
            + jnp.dot(xgb_x, f1_xgb, preferred_element_type=jnp.float32)
            + f1_b
        )
        f2_w = fin_ref[offs["f2_w"]:offs["f2_w"] + CP, 0:NP]
        f2_b = fin_ref[offs["f2_b"]:offs["f2_b"] + 1, 0:NP]
        out_ref[...] = (
            jnp.dot(z1[:, 0:CP], f2_w, preferred_element_type=jnp.float32) + f2_b
        )

    vmem = pl.BlockSpec(memory_space=pltpu.MemorySpace.VMEM)
    out_pad = pl.pallas_call(
        kernel,
        out_shape=jax.ShapeDtypeStruct((B, NP), jnp.float32),
        in_specs=[vmem] * 5,
        out_specs=vmem,
        scratch_shapes=[pltpu.VMEM((T * B, G), jnp.float32)],
    )(x_tm, ex, packed["proj"], packed["w_hh"], packed["fin"])
    return out_pad[:, :NC]


# ------------------------- pure-JAX reference ------------------------------ #
def reference_forward(home_seq, away_seq, elo, xgb, params):
    H = params["w_hh_h"].shape[0]
    hp = jax.lax.Precision.HIGHEST

    def lstm_last_h(seq, w_ih, w_hh, b):
        B, T, _ = seq.shape
        h = jnp.zeros((B, H), jnp.float32)
        c = jnp.zeros((B, H), jnp.float32)
        for t in range(T):
            gates = (jnp.dot(seq[:, t, :], w_ih, precision=hp)
                     + jnp.dot(h, w_hh, precision=hp) + b)
            i_g = jax.nn.sigmoid(gates[:, 0 * H:1 * H])
            f_g = jax.nn.sigmoid(gates[:, 1 * H:2 * H])
            g_g = jnp.tanh(gates[:, 2 * H:3 * H])
            o_g = jax.nn.sigmoid(gates[:, 3 * H:4 * H])
            c = f_g * c + i_g * g_g
            h = o_g * jnp.tanh(c)
        return h

    def layer_norm(x, g, b, eps=1e-5):
        m = jnp.mean(x, axis=-1, keepdims=True)
        v = jnp.mean((x - m) ** 2, axis=-1, keepdims=True)
        return (x - m) / jnp.sqrt(v + eps) * g + b

    hh = layer_norm(lstm_last_h(home_seq, params["w_ih_h"], params["w_hh_h"], params["b_h"]),
                    params["ln_h_g"], params["ln_h_b"])
    ha = layer_norm(lstm_last_h(away_seq, params["w_ih_a"], params["w_hh_a"], params["b_a"]),
                    params["ln_a_g"], params["ln_a_b"])
    e1 = jax.nn.relu(jnp.dot(elo, params["elo_w1"], precision=hp) + params["elo_b1"])
    e2 = jax.nn.relu(jnp.dot(e1, params["elo_w2"], precision=hp) + params["elo_b2"])
    combined = jnp.concatenate([hh, ha, e2, xgb], axis=1)
    z1 = jax.nn.relu(jnp.dot(combined, params["fin_w1"], precision=hp) + params["fin_b1"])
    return jnp.dot(z1, params["fin_w2"], precision=hp) + params["fin_b2"]


# ------------------------------- main --------------------------------------- #
if __name__ == "__main__":
    # Module hyperparameters (small, consistent with the PyTorch __init__).
    B = 8                  # batch
    T = 8                  # sequence length
    D = 4                  # lstm_input_size
    H = 32                 # lstm_hidden_size
    E = 2                  # mlp_input_size  (len(elo_features))
    M = 16                 # mlp_hidden_size
    X = 14                 # xgb_input_size  (len(xgb_features))
    NC = 3                 # num_classes
    C_IN = 2 * H + M // 2 + X          # 86
    C_HID = C_IN // 2                  # 43

    key = jax.random.PRNGKey(0)
    ks = jax.random.split(key, 32)
    n = lambda k, s, scale=0.1: (scale * jax.random.normal(k, s)).astype(jnp.float32)

    params = {
        # home LSTM (weights pre-transposed to (in, 4H), gate order i,f,g,o);
        # bias = b_ih + b_hh.
        "w_ih_h": n(ks[0], (D, 4 * H)),
        "w_hh_h": n(ks[1], (H, 4 * H)),
        "b_h":    n(ks[2], (1, 4 * H)),
        # away LSTM
        "w_ih_a": n(ks[3], (D, 4 * H)),
        "w_hh_a": n(ks[4], (H, 4 * H)),
        "b_a":    n(ks[5], (1, 4 * H)),
        # LayerNorms
        "ln_h_g": jnp.ones((1, H), jnp.float32),
        "ln_h_b": jnp.zeros((1, H), jnp.float32),
        "ln_a_g": jnp.ones((1, H), jnp.float32),
        "ln_a_b": jnp.zeros((1, H), jnp.float32),
        # Elo MLP
        "elo_w1": n(ks[6], (E, M)),
        "elo_b1": n(ks[7], (1, M)),
        "elo_w2": n(ks[8], (M, M // 2)),
        "elo_b2": n(ks[9], (1, M // 2)),
        # final layers
        "fin_w1": n(ks[10], (C_IN, C_HID)),
        "fin_b1": n(ks[11], (1, C_HID)),
        "fin_w2": n(ks[12], (C_HID, NC)),
        "fin_b2": n(ks[13], (1, NC)),
    }

    home_seq = n(ks[20], (B, T, D), 1.0)
    away_seq = n(ks[21], (B, T, D), 1.0)
    elo = n(ks[22], (B, E), 1.0)
    xgb = n(ks[23], (B, X), 1.0)

    # One-time parameter packing (outside the per-call hot path).
    packed, dims = prepare_params(params)

    out = dual_lstm_forward(home_seq, away_seq, elo, xgb, packed, dims=dims)
    out = jax.block_until_ready(out)

    ref = reference_forward(home_seq, away_seq, elo, xgb, params)
    assert out.shape == (B, NC), out.shape
    # Tolerance accounts for bf16 MXU operands on the recurrent h@W_hh matmul
    # (f32 accumulation) and the in-kernel input projection; sigmoid-via-tanh
    # with the 0.5 folded into i/f/o weight columns is mathematically exact.
    assert jnp.allclose(out, ref, atol=2e-2, rtol=2e-2), (
        f"max abs err {jnp.max(jnp.abs(out - ref))}"
    )

    print("KERNEL_OK")
</pallas_src>

<mosaic_0001>
module attributes {stable_mosaic.version = 11 : i64} {
  func.func @kernel(%arg0: memref<64x8xf32, #tpu.memory_space<vmem>>, %arg1: memref<8x16xf32, #tpu.memory_space<vmem>>, %arg2: memref<9x256xf32, #tpu.memory_space<vmem>>, %arg3: memref<64x256xbf16, #tpu.memory_space<vmem>>, %arg4: memref<288x128xf32, #tpu.memory_space<vmem>>, %arg5: memref<8x128xf32, #tpu.memory_space<vmem>>, %arg6: memref<64x256xf32, #tpu.memory_space<vmem>>) attributes {dimension_semantics = [], scalar_prefetch = 0 : i64, scratch_operands = 1 : i64, tpu.core_type = #tpu.core_type<tc>} {
    %c0 = arith.constant 0 : index
    %c0_0 = arith.constant 0 : index
    %0 = vector.load %arg0[%c0, %c0_0] : memref<64x8xf32, #tpu.memory_space<vmem>>, vector<64x8xf32>
    %c0_1 = arith.constant 0 : index
    %c0_2 = arith.constant 0 : index
    %1 = vector.load %arg2[%c0_1, %c0_2] : memref<9x256xf32, #tpu.memory_space<vmem>>, vector<8x256xf32>
    %cst = arith.constant dense<0.000000e+00> : vector<64x256xf32>
    %2 = tpu.matmul %0, %1, %cst {dimension_numbers = #tpu.dot_dimension_numbers<[1], [0], [0], [1], [0, 0, 1, 1], [], []>} : vector<64x8xf32>, vector<8x256xf32>, vector<64x256xf32> -> vector<64x256xf32>
    %c8 = arith.constant 8 : index
    %c0_3 = arith.constant 0 : index
    %3 = vector.load %arg2[%c8, %c0_3] : memref<9x256xf32, #tpu.memory_space<vmem>>, vector<1x256xf32>
    %4 = vector.broadcast %3 : vector<1x256xf32> to vector<64x256xf32>
    %5 = arith.addf %2, %4 : vector<64x256xf32>
    %c0_4 = arith.constant 0 : index
    %c0_5 = arith.constant 0 : index
    %6 = vector.load %arg6[%c0_4, %c0_5] : memref<64x256xf32, #tpu.memory_space<vmem>>, vector<64x256xf32>
    tpu.vector_store %arg6[%c0_4, %c0_5], %5 {strides = array<i32>} : memref<64x256xf32, #tpu.memory_space<vmem>>, vector<64x256xf32>,
    %c0_6 = arith.constant 0 : index
    %c0_7 = arith.constant 0 : index
    %7 = vector.load %arg3[%c0_6, %c0_7] : memref<64x256xbf16, #tpu.memory_space<vmem>>, vector<64x256xbf16>
    %cst_8 = arith.constant 0.000000e+00 : f32
    %8 = vector.broadcast %cst_8 : f32 to vector<8x64xf32>
    %cst_9 = arith.constant 0.000000e+00 : f32
    %9 = vector.broadcast %cst_9 : f32 to vector<8x64xf32>
    %c0_i32 = arith.constant 0 : i32
    %c8_i32 = arith.constant 8 : i32
    %10 = arith.muli %c0_i32, %c8_i32 : i32
    %11 = tpu.assume_multiple %10, 8 : i32
    %12 = arith.index_cast %11 : i32 to index
    %c0_10 = arith.constant 0 : index
    %13 = vector.load %arg6[%12, %c0_10] : memref<64x256xf32, #tpu.memory_space<vmem>>, vector<8x256xf32>
    %14 = arith.truncf %8 : vector<8x64xf32> to vector<8x64xbf16>
    %cst_11 = arith.constant dense<0.000000e+00> : vector<8x256xf32>
    %15 = tpu.matmul %14, %7, %cst_11 {dimension_numbers = #tpu.dot_dimension_numbers<[1], [0], [0], [1], [0, 0, 1, 1], [], []>} : vector<8x64xbf16>, vector<64x256xbf16>, vector<8x256xf32> -> vector<8x256xf32>
    %16 = arith.addf %13, %15 : vector<8x256xf32>
    %17 = math.tanh %16 : vector<8x256xf32>
    %18 = vector.extract_strided_slice %17 {offsets = [0, 0], sizes = [8, 192], strides = [1, 1]} : vector<8x256xf32> to vector<8x192xf32>
    %cst_12 = arith.constant 1.000000e+00 : f32
    %19 = vector.broadcast %cst_12 : f32 to vector<8x192xf32>
    %20 = arith.addf %18, %19 : vector<8x192xf32>
    %cst_13 = arith.constant 5.000000e-01 : f32
    %21 = vector.broadcast %cst_13 : f32 to vector<8x192xf32>
    %22 = arith.mulf %21, %20 : vector<8x192xf32>
    %23 = vector.extract_strided_slice %22 {offsets = [0, 0], sizes = [8, 64], strides = [1, 1]} : vector<8x192xf32> to vector<8x64xf32>
    %24 = vector.extract_strided_slice %22 {offsets = [0, 64], sizes = [8, 64], strides = [1, 1]} : vector<8x192xf32> to vector<8x64xf32>
    %25 = vector.extract_strided_slice %22 {offsets = [0, 128], sizes = [8, 64], strides = [1, 1]} : vector<8x192xf32> to vector<8x64xf32>
    %26 = vector.extract_strided_slice %17 {offsets = [0, 192], sizes = [8, 64], strides = [1, 1]} : vector<8x256xf32> to vector<8x64xf32>
    %27 = arith.mulf %24, %9 : vector<8x64xf32>
    %28 = arith.mulf %23, %26 : vector<8x64xf32>
    %29 = arith.addf %27, %28 : vector<8x64xf32>
    %30 = math.tanh %29 : vector<8x64xf32>
    %31 = arith.mulf %25, %30 : vector<8x64xf32>
    %c1_i32 = arith.constant 1 : i32
    %c8_i32_14 = arith.constant 8 : i32
    %32 = arith.muli %c1_i32, %c8_i32_14 : i32
    %33 = tpu.assume_multiple %32, 8 : i32
    %34 = arith.index_cast %33 : i32 to index
    %c0_15 = arith.constant 0 : index
    %35 = vector.load %arg6[%34, %c0_15] : memref<64x256xf32, #tpu.memory_space<vmem>>, vector<8x256xf32>
    %36 = arith.truncf %31 : vector<8x64xf32> to vector<8x64xbf16>
    %cst_16 = arith.constant dense<0.000000e+00> : vector<8x256xf32>
    %37 = tpu.matmul %36, %7, %cst_16 {dimension_numbers = #tpu.dot_dimension_numbers<[1], [0], [0], [1], [0, 0, 1, 1], [], []>} : vector<8x64xbf16>, vector<64x256xbf16>, vector<8x256xf32> -> vector<8x256xf32>
    %38 = arith.addf %35, %37 : vector<8x256xf32>
    %39 = math.tanh %38 : vector<8x256xf32>
    %40 = vector.extract_strided_slice %39 {offsets = [0, 0], sizes = [8, 192], strides = [1, 1]} : vector<8x256xf32> to vector<8x192xf32>
    %cst_17 = arith.constant 1.000000e+00 : f32
    %41 = vector.broadcast %cst_17 : f32 to vector<8x192xf32>
    %42 = arith.addf %40, %41 : vector<8x192xf32>
    %cst_18 = arith.constant 5.000000e-01 : f32
    %43 = vector.broadcast %cst_18 : f32 to vector<8x192xf32>
    %44 = arith.mulf %43, %42 : vector<8x192xf32>
    %45 = vector.extract_strided_slice %44 {offsets = [0, 0], sizes = [8, 64], strides = [1, 1]} : vector<8x192xf32> to vector<8x64xf32>
    %46 = vector.extract_strided_slice %44 {offsets = [0, 64], sizes = [8, 64], strides = [1, 1]} : vector<8x192xf32> to vector<8x64xf32>
    %47 = vector.extract_strided_slice %44 {offsets = [0, 128], sizes = [8, 64], strides = [1, 1]} : vector<8x192xf32> to vector<8x64xf32>
    %48 = vector.extract_strided_slice %39 {offsets = [0, 192], sizes = [8, 64], strides = [1, 1]} : vector<8x256xf32> to vector<8x64xf32>
    %49 = arith.mulf %46, %29 : vector<8x64xf32>
    %50 = arith.mulf %45, %48 : vector<8x64xf32>
    %51 = arith.addf %49, %50 : vector<8x64xf32>
    %52 = math.tanh %51 : vector<8x64xf32>
    %53 = arith.mulf %47, %52 : vector<8x64xf32>
    %c2_i32 = arith.constant 2 : i32
    %c8_i32_19 = arith.constant 8 : i32
    %54 = arith.muli %c2_i32, %c8_i32_19 : i32
    %55 = tpu.assume_multiple %54, 8 : i32
    %56 = arith.index_cast %55 : i32 to index
    %c0_20 = arith.constant 0 : index
    %57 = vector.load %arg6[%56, %c0_20] : memref<64x256xf32, #tpu.memory_space<vmem>>, vector<8x256xf32>
    %58 = arith.truncf %53 : vector<8x64xf32> to vector<8x64xbf16>
    %cst_21 = arith.constant dense<0.000000e+00> : vector<8x256xf32>
    %59 = tpu.matmul %58, %7, %cst_21 {dimension_numbers = #tpu.dot_dimension_numbers<[1], [0], [0], [1], [0, 0, 1, 1], [], []>} : vector<8x64xbf16>, vector<64x256xbf16>, vector<8x256xf32> -> vector<8x256xf32>
    %60 = arith.addf %57, %59 : vector<8x256xf32>
    %61 = math.tanh %60 : vector<8x256xf32>
    %62 = vector.extract_strided_slice %61 {offsets = [0, 0], sizes = [8, 192], strides = [1, 1]} : vector<8x256xf32> to vector<8x192xf32>
    %cst_22 = arith.constant 1.000000e+00 : f32
    %63 = vector.broadcast %cst_22 : f32 to vector<8x192xf32>
    %64 = arith.addf %62, %63 : vector<8x192xf32>
    %cst_23 = arith.constant 5.000000e-01 : f32
    %65 = vector.broadcast %cst_23 : f32 to vector<8x192xf32>
    %66 = arith.mulf %65, %64 : vector<8x192xf32>
    %67 = vector.extract_strided_slice %66 {offsets = [0, 0], sizes = [8, 64], strides = [1, 1]} : vector<8x192xf32> to vector<8x64xf32>
    %68 = vector.extract_strided_slice %66 {offsets = [0, 64], sizes = [8, 64], strides = [1, 1]} : vector<8x192xf32> to vector<8x64xf32>
    %69 = vector.extract_strided_slice %66 {offsets = [0, 128], sizes = [8, 64], strides = [1, 1]} : vector<8x192xf32> to vector<8x64xf32>
    %70 = vector.extract_strided_slice %61 {offsets = [0, 192], sizes = [8, 64], strides = [1, 1]} : vector<8x256xf32> to vector<8x64xf32>
    %71 = arith.mulf %68, %51 : vector<8x64xf32>
    %72 = arith.mulf %67, %70 : vector<8x64xf32>
    %73 = arith.addf %71, %72 : vector<8x64xf32>
    %74 = math.tanh %73 : vector<8x64xf32>
    %75 = arith.mulf %69, %74 : vector<8x64xf32>
    %c3_i32 = arith.constant 3 : i32
    %c8_i32_24 = arith.constant 8 : i32
    %76 = arith.muli %c3_i32, %c8_i32_24 : i32
    %77 = tpu.assume_multiple %76, 8 : i32
    %78 = arith.index_cast %77 : i32 to index
    %c0_25 = arith.constant 0 : index
    %79 = vector.load %arg6[%78, %c0_25] : memref<64x256xf32, #tpu.memory_space<vmem>>, vector<8x256xf32>
    %80 = arith.truncf %75 : vector<8x64xf32> to vector<8x64xbf16>
    %cst_26 = arith.constant dense<0.000000e+00> : vector<8x256xf32>
    %81 = tpu.matmul %80, %7, %cst_26 {dimension_numbers = #tpu.dot_dimension_numbers<[1], [0], [0], [1], [0, 0, 1, 1], [], []>} : vector<8x64xbf16>, vector<64x256xbf16>, vector<8x256xf32> -> vector<8x256xf32>
    %82 = arith.addf %79, %81 : vector<8x256xf32>
    %83 = math.tanh %82 : vector<8x256xf32>
    %84 = vector.extract_strided_slice %83 {offsets = [0, 0], sizes = [8, 192], strides = [1, 1]} : vector<8x256xf32> to vector<8x192xf32>
    %cst_27 = arith.constant 1.000000e+00 : f32
    %85 = vector.broadcast %cst_27 : f32 to vector<8x192xf32>
    %86 = arith.addf %84, %85 : vector<8x192xf32>
    %cst_28 = arith.constant 5.000000e-01 : f32
    %87 = vector.broadcast %cst_28 : f32 to vector<8x192xf32>
    %88 = arith.mulf %87, %86 : vector<8x192xf32>
    %89 = vector.extract_strided_slice %88 {offsets = [0, 0], sizes = [8, 64], strides = [1, 1]} : vector<8x192xf32> to vector<8x64xf32>
    %90 = vector.extract_strided_slice %88 {offsets = [0, 64], sizes = [8, 64], strides = [1, 1]} : vector<8x192xf32> to vector<8x64xf32>
    %91 = vector.extract_strided_slice %88 {offsets = [0, 128], sizes = [8, 64], strides = [1, 1]} : vector<8x192xf32> to vector<8x64xf32>
    %92 = vector.extract_strided_slice %83 {offsets = [0, 192], sizes = [8, 64], strides = [1, 1]} : vector<8x256xf32> to vector<8x64xf32>
    %93 = arith.mulf %90, %73 : vector<8x64xf32>
    %94 = arith.mulf %89, %92 : vector<8x64xf32>
    %95 = arith.addf %93, %94 : vector<8x64xf32>
    %96 = math.tanh %95 : vector<8x64xf32>
    %97 = arith.mulf %91, %96 : vector<8x64xf32>
    %c4_i32 = arith.constant 4 : i32
    %c8_i32_29 = arith.constant 8 : i32
    %98 = arith.muli %c4_i32, %c8_i32_29 : i32
    %99 = tpu.assume_multiple %98, 8 : i32
    %100 = arith.index_cast %99 : i32 to index
    %c0_30 = arith.constant 0 : index
    %101 = vector.load %arg6[%100, %c0_30] : memref<64x256xf32, #tpu.memory_space<vmem>>, vector<8x256xf32>
    %102 = arith.truncf %97 : vector<8x64xf32> to vector<8x64xbf16>
    %cst_31 = arith.constant dense<0.000000e+00> : vector<8x256xf32>
    %103 = tpu.matmul %102, %7, %cst_31 {dimension_numbers = #tpu.dot_dimension_numbers<[1], [0], [0], [1], [0, 0, 1, 1], [], []>} : vector<8x64xbf16>, vector<64x256xbf16>, vector<8x256xf32> -> vector<8x256xf32>
    %104 = arith.addf %101, %103 : vector<8x256xf32>
    %105 = math.tanh %104 : vector<8x256xf32>
    %106 = vector.extract_strided_slice %105 {offsets = [0, 0], sizes = [8, 192], strides = [1, 1]} : vector<8x256xf32> to vector<8x192xf32>
    %cst_32 = arith.constant 1.000000e+00 : f32
    %107 = vector.broadcast %cst_32 : f32 to vector<8x192xf32>
    %108 = arith.addf %106, %107 : vector<8x192xf32>
    %cst_33 = arith.constant 5.000000e-01 : f32
    %109 = vector.broadcast %cst_33 : f32 to vector<8x192xf32>
    %110 = arith.mulf %109, %108 : vector<8x192xf32>
    %111 = vector.extract_strided_slice %110 {offsets = [0, 0], sizes = [8, 64], strides = [1, 1]} : vector<8x192xf32> to vector<8x64xf32>
    %112 = vector.extract_strided_slice %110 {offsets = [0, 64], sizes = [8, 64], strides = [1, 1]} : vector<8x192xf32> to vector<8x64xf32>
    %113 = vector.extract_strided_slice %110 {offsets = [0, 128], sizes = [8, 64], strides = [1, 1]} : vector<8x192xf32> to vector<8x64xf32>
    %114 = vector.extract_strided_slice %105 {offsets = [0, 192], sizes = [8, 64], strides = [1, 1]} : vector<8x256xf32> to vector<8x64xf32>
    %115 = arith.mulf %112, %95 : vector<8x64xf32>
    %116 = arith.mulf %111, %114 : vector<8x64xf32>
    %117 = arith.addf %115, %116 : vector<8x64xf32>
    %118 = math.tanh %117 : vector<8x64xf32>
    %119 = arith.mulf %113, %118 : vector<8x64xf32>
    %c5_i32 = arith.constant 5 : i32
    %c8_i32_34 = arith.constant 8 : i32
    %120 = arith.muli %c5_i32, %c8_i32_34 : i32
    %121 = tpu.assume_multiple %120, 8 : i32
    %122 = arith.index_cast %121 : i32 to index
    %c0_35 = arith.constant 0 : index
    %123 = vector.load %arg6[%122, %c0_35] : memref<64x256xf32, #tpu.memory_space<vmem>>, vector<8x256xf32>
    %124 = arith.truncf %119 : vector<8x64xf32> to vector<8x64xbf16>
    %cst_36 = arith.constant dense<0.000000e+00> : vector<8x256xf32>
    %125 = tpu.matmul %124, %7, %cst_36 {dimension_numbers = #tpu.dot_dimension_numbers<[1], [0], [0], [1], [0, 0, 1, 1], [], []>} : vector<8x64xbf16>, vector<64x256xbf16>, vector<8x256xf32> -> vector<8x256xf32>
    %126 = arith.addf %123, %125 : vector<8x256xf32>
    %127 = math.tanh %126 : vector<8x256xf32>
    %128 = vector.extract_strided_slice %127 {offsets = [0, 0], sizes = [8, 192], strides = [1, 1]} : vector<8x256xf32> to vector<8x192xf32>
    %cst_37 = arith.constant 1.000000e+00 : f32
    %129 = vector.broadcast %cst_37 : f32 to vector<8x192xf32>
    %130 = arith.addf %128, %129 : vector<8x192xf32>
    %cst_38 = arith.constant 5.000000e-01 : f32
    %131 = vector.broadcast %cst_38 : f32 to vector<8x192xf32>
    %132 = arith.mulf %131, %130 : vector<8x192xf32>
    %133 = vector.extract_strided_slice %132 {offsets = [0, 0], sizes = [8, 64], strides = [1, 1]} : vector<8x192xf32> to vector<8x64xf32>
    %134 = vector.extract_strided_slice %132 {offsets = [0, 64], sizes = [8, 64], strides = [1, 1]} : vector<8x192xf32> to vector<8x64xf32>
    %135 = vector.extract_strided_slice %132 {offsets = [0, 128], sizes = [8, 64], strides = [1, 1]} : vector<8x192xf32> to vector<8x64xf32>
    %136 = vector.extract_strided_slice %127 {offsets = [0, 192], sizes = [8, 64], strides = [1, 1]} : vector<8x256xf32> to vector<8x64xf32>
    %137 = arith.mulf %134, %117 : vector<8x64xf32>
    %138 = arith.mulf %133, %136 : vector<8x64xf32>
    %139 = arith.addf %137, %138 : vector<8x64xf32>
    %140 = math.tanh %139 : vector<8x64xf32>
    %141 = arith.mulf %135, %140 : vector<8x64xf32>
    %c6_i32 = arith.constant 6 : i32
    %c8_i32_39 = arith.constant 8 : i32
    %142 = arith.muli %c6_i32, %c8_i32_39 : i32
    %143 = tpu.assume_multiple %142, 8 : i32
    %144 = arith.index_cast %143 : i32 to index
    %c0_40 = arith.constant 0 : index
    %145 = vector.load %arg6[%144, %c0_40] : memref<64x256xf32, #tpu.memory_space<vmem>>, vector<8x256xf32>
    %146 = arith.truncf %141 : vector<8x64xf32> to vector<8x64xbf16>
    %cst_41 = arith.constant dense<0.000000e+00> : vector<8x256xf32>
    %147 = tpu.matmul %146, %7, %cst_41 {dimension_numbers = #tpu.dot_dimension_numbers<[1], [0], [0], [1], [0, 0, 1, 1], [], []>} : vector<8x64xbf16>, vector<64x256xbf16>, vector<8x256xf32> -> vector<8x256xf32>
    %148 = arith.addf %145, %147 : vector<8x256xf32>
    %149 = math.tanh %148 : vector<8x256xf32>
    %150 = vector.extract_strided_slice %149 {offsets = [0, 0], sizes = [8, 192], strides = [1, 1]} : vector<8x256xf32> to vector<8x192xf32>
    %cst_42 = arith.constant 1.000000e+00 : f32
    %151 = vector.broadcast %cst_42 : f32 to vector<8x192xf32>
    %152 = arith.addf %150, %151 : vector<8x192xf32>
    %cst_43 = arith.constant 5.000000e-01 : f32
    %153 = vector.broadcast %cst_43 : f32 to vector<8x192xf32>
    %154 = arith.mulf %153, %152 : vector<8x192xf32>
    %155 = vector.extract_strided_slice %154 {offsets = [0, 0], sizes = [8, 64], strides = [1, 1]} : vector<8x192xf32> to vector<8x64xf32>
    %156 = vector.extract_strided_slice %154 {offsets = [0, 64], sizes = [8, 64], strides = [1, 1]} : vector<8x192xf32> to vector<8x64xf32>
    %157 = vector.extract_strided_slice %154 {offsets = [0, 128], sizes = [8, 64], strides = [1, 1]} : vector<8x192xf32> to vector<8x64xf32>
    %158 = vector.extract_strided_slice %149 {offsets = [0, 192], sizes = [8, 64], strides = [1, 1]} : vector<8x256xf32> to vector<8x64xf32>
    %159 = arith.mulf %156, %139 : vector<8x64xf32>
    %160 = arith.mulf %155, %158 : vector<8x64xf32>
    %161 = arith.addf %159, %160 : vector<8x64xf32>
    %162 = math.tanh %161 : vector<8x64xf32>
    %163 = arith.mulf %157, %162 : vector<8x64xf32>
    %c7_i32 = arith.constant 7 : i32
    %c8_i32_44 = arith.constant 8 : i32
    %164 = arith.muli %c7_i32, %c8_i32_44 : i32
    %165 = tpu.assume_multiple %164, 8 : i32
    %166 = arith.index_cast %165 : i32 to index
    %c0_45 = arith.constant 0 : index
    %167 = vector.load %arg6[%166, %c0_45] : memref<64x256xf32, #tpu.memory_space<vmem>>, vector<8x256xf32>
    %168 = arith.truncf %163 : vector<8x64xf32> to vector<8x64xbf16>
    %cst_46 = arith.constant dense<0.000000e+00> : vector<8x256xf32>
    %169 = tpu.matmul %168, %7, %cst_46 {dimension_numbers = #tpu.dot_dimension_numbers<[1], [0], [0], [1], [0, 0, 1, 1], [], []>} : vector<8x64xbf16>, vector<64x256xbf16>, vector<8x256xf32> -> vector<8x256xf32>
    %170 = arith.addf %167, %169 : vector<8x256xf32>
    %171 = math.tanh %170 : vector<8x256xf32>
    %172 = vector.extract_strided_slice %171 {offsets = [0, 0], sizes = [8, 192], strides = [1, 1]} : vector<8x256xf32> to vector<8x192xf32>
    %cst_47 = arith.constant 1.000000e+00 : f32
    %173 = vector.broadcast %cst_47 : f32 to vector<8x192xf32>
    %174 = arith.addf %172, %173 : vector<8x192xf32>
    %cst_48 = arith.constant 5.000000e-01 : f32
    %175 = vector.broadcast %cst_48 : f32 to vector<8x192xf32>
    %176 = arith.mulf %175, %174 : vector<8x192xf32>
    %177 = vector.extract_strided_slice %176 {offsets = [0, 0], sizes = [8, 64], strides = [1, 1]} : vector<8x192xf32> to vector<8x64xf32>
    %178 = vector.extract_strided_slice %176 {offsets = [0, 64], sizes = [8, 64], strides = [1, 1]} : vector<8x192xf32> to vector<8x64xf32>
    %179 = vector.extract_strided_slice %176 {offsets = [0, 128], sizes = [8, 64], strides = [1, 1]} : vector<8x192xf32> to vector<8x64xf32>
    %180 = vector.extract_strided_slice %171 {offsets = [0, 192], sizes = [8, 64], strides = [1, 1]} : vector<8x256xf32> to vector<8x64xf32>
    %181 = arith.mulf %178, %161 : vector<8x64xf32>
    %182 = arith.mulf %177, %180 : vector<8x64xf32>
    %183 = arith.addf %181, %182 : vector<8x64xf32>
    %184 = math.tanh %183 : vector<8x64xf32>
    %185 = arith.mulf %179, %184 : vector<8x64xf32>
    %c8_i32_49 = arith.constant 8 : i32
    %c0_50 = arith.constant 0 : index
    %c0_51 = arith.constant 0 : index
    %186 = vector.load %arg4[%c0_50, %c0_51] : memref<288x128xf32, #tpu.memory_space<vmem>>, vector<1x64xf32>
    %c8_52 = arith.constant 8 : index
    %c0_53 = arith.constant 0 : index
    %187 = vector.load %arg4[%c8_52, %c0_53] : memref<288x128xf32, #tpu.memory_space<vmem>>, vector<1x64xf32>
    %188 = vector.extract_strided_slice %185 {offsets = [0, 0], sizes = [8, 32], strides = [1, 1]} : vector<8x64xf32> to vector<8x32xf32>
    %189 = vector.extract_strided_slice %186 {offsets = [0, 0], sizes = [1, 32], strides = [1, 1]} : vector<1x64xf32> to vector<1x32xf32>
    %190 = vector.extract_strided_slice %187 {offsets = [0, 0], sizes = [1, 32], strides = [1, 1]} : vector<1x64xf32> to vector<1x32xf32>
    %cst_54 = arith.constant dense<0.000000e+00> : vector<8xf32>
    %191 = vector.multi_reduction <add>, %188, %cst_54 [1] : vector<8x32xf32> to vector<8xf32>
    %192 = vector.shape_cast %191 : vector<8xf32> to vector<8x1xf32>
    %cst_55 = arith.constant 3.200000e+01 : f32
    %193 = vector.broadcast %cst_55 : f32 to vector<8x1xf32>
    %194 = arith.divf %192, %193 : vector<8x1xf32>
    %195 = vector.broadcast %194 : vector<8x1xf32> to vector<8x32xf32>
    %196 = arith.subf %188, %195 : vector<8x32xf32>
    %197 = arith.mulf %196, %196 : vector<8x32xf32>
    %cst_56 = arith.constant dense<0.000000e+00> : vector<8xf32>
    %198 = vector.multi_reduction <add>, %197, %cst_56 [1] : vector<8x32xf32> to vector<8xf32>
    %199 = vector.shape_cast %198 : vector<8xf32> to vector<8x1xf32>
    %cst_57 = arith.constant 3.200000e+01 : f32
    %200 = vector.broadcast %cst_57 : f32 to vector<8x1xf32>
    %201 = arith.divf %199, %200 : vector<8x1xf32>
    %202 = vector.broadcast %194 : vector<8x1xf32> to vector<8x32xf32>
    %203 = arith.subf %188, %202 : vector<8x32xf32>
    %cst_58 = arith.constant 9.99999974E-6 : f32
    %204 = vector.broadcast %cst_58 : f32 to vector<8x1xf32>
    %205 = arith.addf %201, %204 : vector<8x1xf32>
    %206 = math.rsqrt %205 : vector<8x1xf32>
    %207 = vector.broadcast %206 : vector<8x1xf32> to vector<8x32xf32>
    %208 = arith.mulf %203, %207 : vector<8x32xf32>
    %209 = vector.broadcast %189 : vector<1x32xf32> to vector<8x32xf32>
    %210 = arith.mulf %208, %209 : vector<8x32xf32>
    %211 = vector.broadcast %190 : vector<1x32xf32> to vector<8x32xf32>
    %212 = arith.addf %210, %211 : vector<8x32xf32>
    %213 = vector.extract_strided_slice %185 {offsets = [0, 32], sizes = [8, 32], strides = [1, 1]} : vector<8x64xf32> to vector<8x32xf32>
    %214 = vector.extract_strided_slice %186 {offsets = [0, 32], sizes = [1, 32], strides = [1, 1]} : vector<1x64xf32> to vector<1x32xf32>
    %215 = vector.extract_strided_slice %187 {offsets = [0, 32], sizes = [1, 32], strides = [1, 1]} : vector<1x64xf32> to vector<1x32xf32>
    %cst_59 = arith.constant dense<0.000000e+00> : vector<8xf32>
    %216 = vector.multi_reduction <add>, %213, %cst_59 [1] : vector<8x32xf32> to vector<8xf32>
    %217 = vector.shape_cast %216 : vector<8xf32> to vector<8x1xf32>
    %cst_60 = arith.constant 3.200000e+01 : f32
    %218 = vector.broadcast %cst_60 : f32 to vector<8x1xf32>
    %219 = arith.divf %217, %218 : vector<8x1xf32>
    %220 = vector.broadcast %219 : vector<8x1xf32> to vector<8x32xf32>
    %221 = arith.subf %213, %220 : vector<8x32xf32>
    %222 = arith.mulf %221, %221 : vector<8x32xf32>
    %cst_61 = arith.constant dense<0.000000e+00> : vector<8xf32>
    %223 = vector.multi_reduction <add>, %222, %cst_61 [1] : vector<8x32xf32> to vector<8xf32>
    %224 = vector.shape_cast %223 : vector<8xf32> to vector<8x1xf32>
    %cst_62 = arith.constant 3.200000e+01 : f32
    %225 = vector.broadcast %cst_62 : f32 to vector<8x1xf32>
    %226 = arith.divf %224, %225 : vector<8x1xf32>
    %227 = vector.broadcast %219 : vector<8x1xf32> to vector<8x32xf32>
    %228 = arith.subf %213, %227 : vector<8x32xf32>
    %cst_63 = arith.constant 9.99999974E-6 : f32
    %229 = vector.broadcast %cst_63 : f32 to vector<8x1xf32>
    %230 = arith.addf %226, %229 : vector<8x1xf32>
    %231 = math.rsqrt %230 : vector<8x1xf32>
    %232 = vector.broadcast %231 : vector<8x1xf32> to vector<8x32xf32>
    %233 = arith.mulf %228, %232 : vector<8x32xf32>
    %234 = vector.broadcast %214 : vector<1x32xf32> to vector<8x32xf32>
    %235 = arith.mulf %233, %234 : vector<8x32xf32>
    %236 = vector.broadcast %215 : vector<1x32xf32> to vector<8x32xf32>
    %237 = arith.addf %235, %236 : vector<8x32xf32>
    %c0_64 = arith.constant 0 : index
    %c0_65 = arith.constant 0 : index
    %238 = vector.load %arg1[%c0_64, %c0_65] : memref<8x16xf32, #tpu.memory_space<vmem>>, vector<8x2xf32>
    %c0_66 = arith.constant 0 : index
    %c2 = arith.constant 2 : index
    %239 = vector.load %arg1[%c0_66, %c2] : memref<8x16xf32, #tpu.memory_space<vmem>>, vector<8x14xf32>
    %c16 = arith.constant 16 : index
    %c0_67 = arith.constant 0 : index
    %240 = vector.load %arg4[%c16, %c0_67] : memref<288x128xf32, #tpu.memory_space<vmem>>, vector<2x16xf32>
    %c24 = arith.constant 24 : index
    %c0_68 = arith.constant 0 : index
    %241 = vector.load %arg4[%c24, %c0_68] : memref<288x128xf32, #tpu.memory_space<vmem>>, vector<1x16xf32>
    %c32 = arith.constant 32 : index
    %c0_69 = arith.constant 0 : index
    %242 = vector.load %arg4[%c32, %c0_69] : memref<288x128xf32, #tpu.memory_space<vmem>>, vector<16x8xf32>
    %c48 = arith.constant 48 : index
    %c0_70 = arith.constant 0 : index
    %243 = vector.load %arg4[%c48, %c0_70] : memref<288x128xf32, #tpu.memory_space<vmem>>, vector<1x8xf32>
    %cst_71 = arith.constant dense<0.000000e+00> : vector<8x16xf32>
    %244 = tpu.matmul %238, %240, %cst_71 {dimension_numbers = #tpu.dot_dimension_numbers<[1], [0], [0], [1], [0, 0, 1, 1], [], []>} : vector<8x2xf32>, vector<2x16xf32>, vector<8x16xf32> -> vector<8x16xf32>
    %245 = vector.broadcast %241 : vector<1x16xf32> to vector<8x16xf32>
    %246 = arith.addf %244, %245 : vector<8x16xf32>
    %cst_72 = arith.constant 0.000000e+00 : f32
    %247 = vector.broadcast %cst_72 : f32 to vector<8x16xf32>
    %248 = arith.maximumf %246, %247 : vector<8x16xf32>
    %cst_73 = arith.constant dense<0.000000e+00> : vector<8x8xf32>
    %249 = tpu.matmul %248, %242, %cst_73 {dimension_numbers = #tpu.dot_dimension_numbers<[1], [0], [0], [1], [0, 0, 1, 1], [], []>} : vector<8x16xf32>, vector<16x8xf32>, vector<8x8xf32> -> vector<8x8xf32>
    %250 = vector.broadcast %243 : vector<1x8xf32> to vector<8x8xf32>
    %251 = arith.addf %249, %250 : vector<8x8xf32>
    %cst_74 = arith.constant 0.000000e+00 : f32
    %252 = vector.broadcast %cst_74 : f32 to vector<8x8xf32>
    %253 = arith.maximumf %251, %252 : vector<8x8xf32>
    %c56 = arith.constant 56 : index
    %c0_75 = arith.constant 0 : index
    %254 = vector.load %arg4[%c56, %c0_75] : memref<288x128xf32, #tpu.memory_space<vmem>>, vector<32x128xf32>
    %c88 = arith.constant 88 : index
    %c0_76 = arith.constant 0 : index
    %255 = vector.load %arg4[%c88, %c0_76] : memref<288x128xf32, #tpu.memory_space<vmem>>, vector<32x128xf32>
    %c120 = arith.constant 120 : index
    %c0_77 = arith.constant 0 : index
    %256 = vector.load %arg4[%c120, %c0_77] : memref<288x128xf32, #tpu.memory_space<vmem>>, vector<8x128xf32>
    %c128 = arith.constant 128 : index
    %c0_78 = arith.constant 0 : index
    %257 = vector.load %arg4[%c128, %c0_78] : memref<288x128xf32, #tpu.memory_space<vmem>>, vector<14x128xf32>
    %c144 = arith.constant 144 : index
    %c0_79 = arith.constant 0 : index
    %258 = vector.load %arg4[%c144, %c0_79] : memref<288x128xf32, #tpu.memory_space<vmem>>, vector<1x128xf32>
    %cst_80 = arith.constant dense<0.000000e+00> : vector<8x128xf32>
    %259 = tpu.matmul %212, %254, %cst_80 {dimension_numbers = #tpu.dot_dimension_numbers<[1], [0], [0], [1], [0, 0, 1, 1], [], []>} : vector<8x32xf32>, vector<32x128xf32>, vector<8x128xf32> -> vector<8x128xf32>
    %cst_81 = arith.constant dense<0.000000e+00> : vector<8x128xf32>
    %260 = tpu.matmul %237, %255, %cst_81 {dimension_numbers = #tpu.dot_dimension_numbers<[1], [0], [0], [1], [0, 0, 1, 1], [], []>} : vector<8x32xf32>, vector<32x128xf32>, vector<8x128xf32> -> vector<8x128xf32>
    %261 = arith.addf %259, %260 : vector<8x128xf32>
    %cst_82 = arith.constant dense<0.000000e+00> : vector<8x128xf32>
    %262 = tpu.matmul %253, %256, %cst_82 {dimension_numbers = #tpu.dot_dimension_numbers<[1], [0], [0], [1], [0, 0, 1, 1], [], []>} : vector<8x8xf32>, vector<8x128xf32>, vector<8x128xf32> -> vector<8x128xf32>
    %263 = arith.addf %261, %262 : vector<8x128xf32>
    %cst_83 = arith.constant dense<0.000000e+00> : vector<8x128xf32>
    %264 = tpu.matmul %239, %257, %cst_83 {dimension_numbers = #tpu.dot_dimension_numbers<[1], [0], [0], [1], [0, 0, 1, 1], [], []>} : vector<8x14xf32>, vector<14x128xf32>, vector<8x128xf32> -> vector<8x128xf32>
    %265 = arith.addf %263, %264 : vector<8x128xf32>
    %266 = vector.broadcast %258 : vector<1x128xf32> to vector<8x128xf32>
    %267 = arith.addf %265, %266 : vector<8x128xf32>
    %cst_84 = arith.constant 0.000000e+00 : f32
    %268 = vector.broadcast %cst_84 : f32 to vector<8x128xf32>
    %269 = arith.maximumf %267, %268 : vector<8x128xf32>
    %c152 = arith.constant 152 : index
    %c0_85 = arith.constant 0 : index
    %270 = vector.load %arg4[%c152, %c0_85] : memref<288x128xf32, #tpu.memory_space<vmem>>, vector<128x128xf32>
    %c280 = arith.constant 280 : index
    %c0_86 = arith.constant 0 : index
    %271 = vector.load %arg4[%c280, %c0_86] : memref<288x128xf32, #tpu.memory_space<vmem>>, vector<1x128xf32>
    %cst_87 = arith.constant dense<0.000000e+00> : vector<8x128xf32>
    %272 = tpu.matmul %269, %270, %cst_87 {dimension_numbers = #tpu.dot_dimension_numbers<[1], [0], [0], [1], [0, 0, 1, 1], [], []>} : vector<8x128xf32>, vector<128x128xf32>, vector<8x128xf32> -> vector<8x128xf32>
    %273 = vector.broadcast %271 : vector<1x128xf32> to vector<8x128xf32>
    %274 = arith.addf %272, %273 : vector<8x128xf32>
    %c0_88 = arith.constant 0 : index
    %c0_89 = arith.constant 0 : index
    %275 = vector.load %arg5[%c0_88, %c0_89] : memref<8x128xf32, #tpu.memory_space<vmem>>, vector<8x128xf32>
    tpu.vector_store %arg5[%c0_88, %c0_89], %274 {strides = array<i32>} : memref<8x128xf32, #tpu.memory_space<vmem>>, vector<8x128xf32>,
    return
  }
}

</mosaic_0001>

<bundles_post_ra>
// kernel: dual_lstm_forward.1
= control target key start
LH: loop header
LB: loop body
LE: loop exit
PB: predicated region body
PF: predicated region fallthrough
CT: control target
= control target key end

     0   :  { %10 = vsyncpa [#allocation4], 0  ;;  %s2269_s0 = inlined_call_operand.vmem [shape: f32[64,8], index: 0, kind: input, shape index: {}]   ;;  %s2270_s1 = inlined_call_operand.vmem [shape: f32[8,16], index: 1, kind: input, shape index: {}]   ;;  %s2271_s2 = inlined_call_operand.hbm [shape: f32[9,256], index: 2, kind: input, shape index: {}]   ;;  %s2272_s3 = inlined_call_operand.hbm [shape: bf16[64,256], index: 3, kind: input, shape index: {}]   ;;  %s2273_s4 = inlined_call_operand.vmem [shape: f32[288,128], index: 4, kind: input, shape index: {}]   ;;  %s2274_s5 = inlined_call_operand.vmem [shape: f32[8,128], index: 5, kind: output, shape index: {}]  }
   0x1   :  { %11 = vsyncpa [#allocation6], 0  ;;  %s1843_s18 = smov [#allocation3]   ;;  %s1795_s22 = scalar_lea.hbm %s2271_s2, 512 }
   0x2   :  { %s21_s19 = sshll.u32 %s1843_s18, 4  ;;  %p1796_p0 = scmp.ne.s32.totalorder %s2271_s2, %s1795_s22  ;;  %s22_s19 = int_to_ptr.vmem [resolvable:$true] %s21_s19 }
   0x3   :  { %p1799_p1 = scmp.lt.u32.totalorder %s1795_s22, %s2271_s2 }
   0x5   :  { %p1801_p2 = pnand %p1799_p1, %p1796_p0 }
   0x7   :  { %1804 = shalt.err (!%p1801_p2)
}
   0x8   :  { %s1805_s27 = scalar_lea.vmem %s22_s19, 512  ;;  %p1810_p4 = scmp.lt.s32.totalorder %s22_s19, %s22_s19 }
   0x9   :  { %p1806_p3 = scmp.ne.s32.totalorder %s22_s19, %s1805_s27  ;;  %p1811_p5 = scmp.lt.s32.totalorder %s1805_s27, %s1805_s27 }
   0xb   :  { %p1812_p6 = por %p1811_p5, %p1810_p4 }
   0xd   :  { %p1813_p7 = pnand %p1812_p6, %p1806_p3 }
   0xf   :  { %1816 = shalt.err (!%p1813_p7)
}
  0x10   :  { %s1844_s28 = smov 256   ;;  %s1845_s29 = smov 16  }
  0x11   :  { %27 = dma.hbm_to_vmem [thread:$0]  %s2271_s2, 512, %s22_s19, [#allocation4], %s1844_s28, %s1844_s28, %s1845_s29  }
  0x12   :  { %s1846_s7 = smov [#allocation5]   ;;  %s1817_s11 = scalar_lea.hbm %s2272_s3, 1024 }
  0x13   :  { %s33_s8 = sshll.u32 %s1846_s7, 4  ;;  %p1818_p8 = scmp.ne.s32.totalorder %s2272_s3, %s1817_s11  ;;  %s34_s8 = int_to_ptr.vmem [resolvable:$true] %s33_s8 }
  0x14   :  { %p1821_p9 = scmp.lt.u32.totalorder %s1817_s11, %s2272_s3 }
  0x16   :  { %p1823_p10 = pnand %p1821_p9, %p1818_p8 }
  0x18   :  { %1826 = shalt.err (!%p1823_p10)
}
  0x19   :  { %s1827_s16 = scalar_lea.vmem %s34_s8, 1024  ;;  %p1832_p12 = scmp.lt.s32.totalorder %s34_s8, %s34_s8 }
  0x1a   :  { %p1828_p11 = scmp.ne.s32.totalorder %s34_s8, %s1827_s16  ;;  %p1833_p13 = scmp.lt.s32.totalorder %s1827_s16, %s1827_s16 }
  0x1c   :  { %p1834_p0 = por %p1833_p13, %p1832_p12 }
  0x1e   :  { %p1835_p1 = pnand %p1834_p0, %p1828_p11 }
  0x20   :  { %1838 = shalt.err (!%p1835_p1)
}
  0x21   :  { %s1847_s2 = smov 128   ;;  %s1848_s17 = smov 8  }
  0x22   :  { %39 = dma.hbm_to_vmem [thread:$0]  %s2272_s3, 1024, %s34_s8, [#allocation6], %s1847_s2, %s1847_s2, %s1848_s17  }
  0x23   :  { %1839 = dma.done.wait [#allocation4], 512  }
  0x24   :  { %1840 = vsyncadd [#allocation4], 4294966784 }
  0x25   :  { %1841 = dma.done.wait [#allocation6], 1024  }
  0x26   :  { %1842 = vsyncadd [#allocation6], 4294966272  ;;  %v1849_v0 = vmov 0.0   ;;  %v58_v1 = vld [vmem:[#allocation3 + $0x8] sm:$0xff]  ;;  %v57_v2 = vld [vmem:[#allocation3] sm:$0xff]  ;;  %vm72_vm0 = vcmask 64512   ;;  %v62_v17 = vlaneseq }
  0x27   :  { %185 = vmatprep.mubr.f32.mxu1 %v1849_v0  ;;  %161 = vmatprep.mubr.f32.mxu0 %v1849_v0  ;;  %v53_v3 = vld [vmem:[%s2269_s0 + $0x20] sm:$0xff]  ;;  %v54_v6 = vld [vmem:[%s2269_s0 + $0x28] sm:$0xff]  ;;  %v1925_v7 = vld [vmem:[#allocation5 + $0x14] ss:$8 sps:$4 sm:$0xff]   ;;  %v1850_v16 = vmov 0   ;;  %s1851_s29 = smov 64  }
  0x28   :  { %1715 = vmatprep.subr.mxu1 %v58_v1  ;;  %v1916_v4 = vld [vmem:[#allocation5 + $0x4] ss:$8 sps:$4 sm:$0xff]   ;;  %97 = vmatprep.subr.mxu0 %v58_v1  ;;  %v1918_v5 = vld [vmem:[#allocation5] ss:$8 sps:$4 sm:$0xff]   ;;  %v1929_v8 = vld [vmem:[#allocation5 + $0x10] ss:$8 sps:$4 sm:$0xff]  }
  0x29   :  { %1716 = vmatpush1.msra.mxu1 %v57_v2  ;;  %98 = vmatpush1.msra.mxu0 %v57_v2  ;;  %v1932_v9 = vld [vmem:[#allocation5 + $0x24] ss:$8 sps:$4 sm:$0xff]   ;;  %v55_v11 = vld [vmem:[%s2269_s0 + $0x30] sm:$0xff]  ;;  %v1944_v12 = vld [vmem:[#allocation5 + $0x20] ss:$8 sps:$4 sm:$0xff]   ;;  %v63_v20 = vshrl.u32 %v62_v17, 7 }
  0x2a   :  { %1521 = vmatmul.mubr.msk.f32.vlgmr.msra.gmra.mrb[0].mxu1 %vm72_vm0, %v53_v3  ;;  %283 = vmatprep.subr.bf16.mxu1 %v1916_v4  ;;  %v49_v10 = vld [vmem:[%s2269_s0] sm:$0xff]  ;;  %v1947_v13 = vld [vmem:[#allocation5 + $0x34] ss:$8 sps:$4 sm:$0xff]   ;;  %v1959_v15 = vld [vmem:[#allocation5 + $0x30] ss:$8 sps:$4 sm:$0xff]   ;;  %vm279_vm1 = vcmask 523264  }
  0x2b   :  { %284 = vmatpush1.bf16.msra.mxu1 %v1918_v5  ;;  %191 = vmatprep.mubr.f32.mxu1 %v1849_v0  ;;  %v56_v14 = vld [vmem:[%s2269_s0 + $0x38] sm:$0xff]  ;;  %v64_v24 = vsub.s32 0, %v63_v20  ;;  %v68_v27 = vsub.s32 1, %v63_v20  ;;  %v50_v51 = vld [vmem:[%s2269_s0 + $0x8] sm:$0xff]  ;;  %vm938_vm2 = vcmask 1041408   ;;  %vm934_vm3 = vcmask 15360  }
  0x2c   :  { %285 = vmatprep.subr.bf16.mxu1 %v1925_v7  ;;  %433 = vmatprep.subr.bf16.mxu0 %v1916_v4  ;;  %v60_v26 = vld [vmem:[#allocation3 + $0x10] ss:$8 sm:$0x3]  ;;  %vm1852_vm4 = vmmov 0   ;;  %s1853_s14 = smov 96   ;;  %vm876_vm5 = vcmask 261120  }
  0x2d   :  { %1517 = vmatmul.mubr.msk.f32.vlgmr.msra.gmra.mrb[0].mxu0 %vm72_vm0, %v49_v10  ;;  %v1994_v30 = vrot.slane %v60_v26, %v64_v24  ;;  %v1996_v31 = vrot.slane %v60_v26, %v68_v27  ;;  %v51_v24 = vld [vmem:[%s2269_s0 + $0x10] sm:$0xff]  ;;  %v52_v26 = vld [vmem:[%s2269_s0 + $0x18] sm:$0xff]  ;;  %vm1017_vm6 = vcmask 130048   ;;  %s1855_s19 = smov 126   ;;  %vm1331_vm7 = vcmask 1045504  }
  0x2e   :  { %1522 = vmatmul.mubr.msk.f32.gmra.mrb[2].mxu1 %vm72_vm0, %v54_v6  ;;  %167 = vmatprep.mubr.f32.mxu0 %v1849_v0  ;;  %vm1856_vm8 = vmmov 1   ;;  %vm1328_vm10 = vcmask 113664  }
  0x2f   :  { %286 = vmatpush1.bf16.msra.mxu1 %v1929_v8  ;;  %197 = vmatprep.mubr.f32.mxu1 %v1849_v0  ;;  %vm1689_vm9 = vmpackc.low %vm1331_vm7, %vm1856_vm8 }
  0x30   :  { %287 = vmatprep.subr.bf16.mxu1 %v1932_v9  ;;  %434 = vmatpush1.bf16.msra.mxu0 %v1918_v5 }
  0x31   :  { %435 = vmatprep.subr.bf16.mxu0 %v1925_v7  ;;  %1518 = vmatmul.mubr.msk.f32.gmra.mrb[2].mxu0 %vm72_vm0, %v50_v51 }
  0x32   :  { %1523 = vmatmul.mubr.msk.f32.gmra.mrb[4].mxu1 %vm72_vm0, %v55_v11  ;;  %173 = vmatprep.mubr.f32.mxu0 %v1849_v0 }
  0x33   :  { %288 = vmatpush1.bf16.msra.mxu1 %v1944_v12  ;;  %203 = vmatprep.mubr.f32.mxu1 %v1849_v0 }
  0x34   :  { %289 = vmatprep.subr.bf16.mxu1 %v1947_v13  ;;  %436 = vmatpush1.bf16.msra.mxu0 %v1929_v8 }
  0x35   :  { %437 = vmatprep.subr.bf16.mxu0 %v1932_v9  ;;  %1519 = vmatmul.mubr.msk.f32.gmra.mrb[4].mxu0 %vm72_vm0, %v51_v24 }
  0x36   :  { %1524 = vmatmul.mubr.msk.f32.gmra.mrb[6].mxu1 %vm72_vm0, %v56_v14  ;;  %179 = vmatprep.mubr.f32.mxu0 %v1849_v0 }
  0x37   :  { %290 = vmatpush1.bf16.msra.mxu1 %v1959_v15  ;;  %315 = vmatprep.mubr.bf16.mxu1 %v1850_v16 }
  0x38   :  { %358 = vmatprep.subr.bf16.mxu1 %v1916_v4  ;;  %438 = vmatpush1.bf16.msra.mxu0 %v1944_v12 }
  0x39   :  { %439 = vmatprep.subr.bf16.mxu0 %v1947_v13  ;;  %1520 = vmatmul.mubr.msk.f32.gmra.mrb[6].mxu0 %vm72_vm0, %v52_v26 }
  0x3a   :  { %316 = vmatmul.mubr.bf16.vlgmr.msra.gmra.mrb[8].mxu1 %v1850_v16  ;;  %465 = vmatprep.mubr.bf16.mxu0 %v1850_v16 }
  0x3b   :  { %359 = vmatpush1.bf16.msra.mxu1 %v1918_v5  ;;  %390 = vmatprep.mubr.bf16.mxu1 %v1850_v16 }
  0x3c   :  { %360 = vmatprep.subr.bf16.mxu1 %v1925_v7  ;;  %440 = vmatpush1.bf16.msra.mxu0 %v1959_v15 }
  0x3d   :  { %583 = vmatprep.subr.bf16.mxu0 %v1916_v4 }
  0x3f   :  { %361 = vmatpush1.bf16.msra.mxu1 %v1929_v8 }
  0x40   :  { %362 = vmatprep.subr.bf16.mxu1 %v1932_v9 }
  0x43   :  { %363 = vmatpush1.bf16.msra.mxu1 %v1944_v12 }
  0x44   :  { %364 = vmatprep.subr.bf16.mxu1 %v1947_v13 }
  0x47   :  { %365 = vmatpush1.bf16.msra.mxu1 %v1959_v15 }
  0x48   :  { %508 = vmatprep.subr.bf16.mxu1 %v1916_v4 }
  0xfd   :  { %v1982_v18 = vpop.f32.mrb[0].mxu1 }
  0xfe   :  { %v1984_v19 = vpop.f32.mrb[1].mxu1 }
 0x100   :  { %v163_v23 = vpop.f32.mrb[0].mxu0 }
 0x101   :  { %v1986_v21 = vpop.f32.mrb[2].mxu1  ;;  %v165_v25 = vpop.f32.mrb[1].mxu0  ;;  %v164_v34 = vadd.f32 %v163_v23, %v1994_v30 }
 0x102   :  { %v1988_v22 = vpop.f32.mrb[3].mxu1  ;;  %v166_v35 = vadd.f32 %v165_v25, %v1996_v31 }
 0x104   :  { %v169_v58 = vpop.f32.mrb[2].mxu0 }
 0x105   :  { %v1990_v28 = vpop.f32.mrb[4].mxu1  ;;  %v171_v59 = vpop.f32.mrb[3].mxu0  ;;  %v170_v60 = vadd.f32 %v169_v58, %v1994_v30 }
 0x106   :  { %v1992_v29 = vpop.f32.mrb[5].mxu1  ;;  %v172_v61 = vadd.f32 %v171_v59, %v1996_v31 }
 0x109   :  { %v1998_v32 = vpop.f32.mrb[6].mxu1 }
 0x10a   :  { %v2000_v33 = vpop.f32.mrb[7].mxu1 }
 0x10d   :  { %v317_v36 = vpop.f32.mrb[8].mxu1 }
 0x10e   :  { %v324_v37 = vadd.f32 %v317_v36, %v164_v34  ;;  %v319_v38 = vpop.f32.mrb[9].mxu1  ;;  %v175_v36 = vpop.f32.mrb[4].mxu0 }
 0x10f   :  { %v325_v39 = vadd.f32 %v319_v38, %v166_v35  ;;  %v321_v40 = vpop.f32.mrb[10].mxu1 }
 0x110   :  { %v322_v41 = vpop.f32.mrb[11].mxu1 }
 0x111   :  { %1743 = vtanh.f32 %v325_v39 }
 0x112   :  { %1745 = vtanh.f32 %v324_v37  ;;  %v177_v37 = vpop.f32.mrb[5].mxu0 }
 0x11b   :  { %v1744_v42 = vpop.eup %1743 }
 0x11c   :  { %334 = vrot.lane.b32.xlu0 %v1744_v42, %s1851_s29  ;;  %v1746_v43 = vpop.eup %1745  ;;  %v329_v53 = vadd.f32 1.0, %v1744_v42 }
 0x11d   :  { %v328_v44 = vadd.f32 1.0, %v1746_v43  ;;  %v181_v43 = vpop.f32.mrb[6].mxu0 }
 0x11e   :  { %v331_v54 = vmul.f32 0.5, %v329_v53 }
 0x11f   :  { %v330_v45 = vmul.f32 0.5, %v328_v44  ;;  %v183_v44 = vpop.f32.mrb[7].mxu0 }
 0x121   :  { %v332_v48 = vmul.f32 0.0, %v330_v45 }
 0x18e   :  { %v335_v46 = vpop.permute.xlu0 %334 }
 0x18f   :  { %v337_v47 = vmul.f32 %v335_v46, %v330_v45  ;;  %v176_v45 = vadd.f32 %v175_v36, %v1994_v30  ;;  %v178_v46 = vadd.f32 %v177_v37, %v1996_v31 }
 0x191   :  { %339 = vrot.lane.b32.xlu0 %v337_v47, %s1851_s29 }
 0x203   :  { %v340_v49 = vpop.permute.xlu0 %339 }
 0x204   :  { %v342_v50 = vadd.f32 %v340_v49, %v332_v48 }
 0x206   :  { %1747 = vtanh.f32 %v342_v50 }
 0x210   :  { %v1748_v52 = vpop.eup %1747 }
 0x211   :  { %345 = vrot.lane.b32.xlu1 %v1748_v52, %s1851_s29 }
 0x283   :  { %v346_v55 = vpop.permute.xlu1 %345 }
 0x284   :  { %v348_v56 = vmul.f32 %v346_v55, %v331_v54 }
 0x286   :  { %v354_v57 = vpack.c.bf16 %v348_v56, %v348_v56 }
 0x288   :  { %1533 = vmatmul.mubr.msk.bf16.vlgmr.msra.gmra.mrb[12].mxu1 %vm279_vm1, %v354_v57 }
 0x289   :  { %509 = vmatpush1.bf16.msra.mxu1 %v1918_v5  ;;  %540 = vmatprep.mubr.bf16.mxu1 %v1850_v16 }
 0x28a   :  { %510 = vmatprep.subr.bf16.mxu1 %v1925_v7 }
 0x28d   :  { %511 = vmatpush1.bf16.msra.mxu1 %v1929_v8 }
 0x28e   :  { %512 = vmatprep.subr.bf16.mxu1 %v1932_v9 }
 0x291   :  { %513 = vmatpush1.bf16.msra.mxu1 %v1944_v12 }
 0x292   :  { %514 = vmatprep.subr.bf16.mxu1 %v1947_v13 }
 0x295   :  { %515 = vmatpush1.bf16.msra.mxu1 %v1959_v15 }
 0x296   :  { %658 = vmatprep.subr.bf16.mxu1 %v1916_v4 }
 0x35b   :  { %v392_v62 = vpop.f32.mrb[12].mxu1 }
 0x35c   :  { %v399_v63 = vadd.f32 %v392_v62, %v170_v60  ;;  %v394_v1 = vpop.f32.mrb[13].mxu1 }
 0x35d   :  { %v400_v2 = vadd.f32 %v394_v1, %v172_v61  ;;  %v396_v3 = vpop.f32.mrb[14].mxu1 }
 0x35e   :  { %v397_v6 = vpop.f32.mrb[15].mxu1 }
 0x35f   :  { %1749 = vtanh.f32 %v400_v2 }
 0x360   :  { %1751 = vtanh.f32 %v399_v63 }
 0x369   :  { %v1750_v10 = vpop.eup %1749 }
 0x36a   :  { %409 = vrot.lane.b32.xlu1 %v1750_v10, %s1851_s29  ;;  %v1752_v11 = vpop.eup %1751  ;;  %v404_v38 = vadd.f32 1.0, %v1750_v10  ;;  %v182_v10 = vadd.f32 %v181_v43, %v1994_v30 }
 0x36b   :  { %v403_v14 = vadd.f32 1.0, %v1752_v11  ;;  %v184_v11 = vadd.f32 %v183_v44, %v1996_v31 }
 0x36c   :  { %v406_v39 = vmul.f32 0.5, %v404_v38 }
 0x36d   :  { %v405_v17 = vmul.f32 0.5, %v403_v14 }
 0x36f   :  { %v407_v25 = vmul.f32 %v405_v17, %v342_v50 }
 0x3dc   :  { %v410_v20 = vpop.permute.xlu1 %409 }
 0x3dd   :  { %v412_v23 = vmul.f32 %v410_v20, %v405_v17 }
 0x3df   :  { %414 = vrot.lane.b32.xlu0 %v412_v23, %s1851_s29 }
 0x451   :  { %v415_v27 = vpop.permute.xlu0 %414 }
 0x452   :  { %v417_v34 = vadd.f32 %v415_v27, %v407_v25 }
 0x454   :  { %1753 = vtanh.f32 %v417_v34 }
 0x45e   :  { %v1754_v35 = vpop.eup %1753 }
 0x45f   :  { %420 = vrot.lane.b32.xlu1 %v1754_v35, %s1851_s29 }
 0x4d1   :  { %v421_v40 = vpop.permute.xlu1 %420 }
 0x4d2   :  { %v423_v41 = vmul.f32 %v421_v40, %v406_v39 }
 0x4d4   :  { %v429_v42 = vpack.c.bf16 %v423_v41, %v423_v41 }
 0x4d6   :  { %1534 = vmatmul.mubr.msk.bf16.vlgmr.msra.gmra.mrb[8].mxu0 %vm279_vm1, %v429_v42 }
 0x4d7   :  { %584 = vmatpush1.bf16.msra.mxu0 %v1918_v5  ;;  %615 = vmatprep.mubr.bf16.mxu0 %v1850_v16 }
 0x4d8   :  { %585 = vmatprep.subr.bf16.mxu0 %v1925_v7 }
 0x4db   :  { %586 = vmatpush1.bf16.msra.mxu0 %v1929_v8 }
 0x4dc   :  { %587 = vmatprep.subr.bf16.mxu0 %v1932_v9 }
 0x4df   :  { %588 = vmatpush1.bf16.msra.mxu0 %v1944_v12 }
 0x4e0   :  { %589 = vmatprep.subr.bf16.mxu0 %v1947_v13 }
 0x4e3   :  { %590 = vmatpush1.bf16.msra.mxu0 %v1959_v15 }
 0x4e4   :  { %733 = vmatprep.subr.bf16.mxu0 %v1916_v4 }
 0x5a9   :  { %v467_v47 = vpop.f32.mrb[8].mxu0 }
 0x5aa   :  { %v474_v48 = vadd.f32 %v467_v47, %v176_v45  ;;  %v469_v49 = vpop.f32.mrb[9].mxu0  ;;  %v190_v47 = vadd.f32 %v1984_v19, %v1996_v31 }
 0x5ab   :  { %v475_v50 = vadd.f32 %v469_v49, %v178_v46  ;;  %v471_v51 = vpop.f32.mrb[10].mxu0  ;;  %v188_v46 = vadd.f32 %v1982_v18, %v1994_v30 }
 0x5ac   :  { %v472_v52 = vpop.f32.mrb[11].mxu0 }
 0x5ad   :  { %1755 = vtanh.f32 %v475_v50 }
 0x5ae   :  { %1757 = vtanh.f32 %v474_v48 }
 0x5b7   :  { %v1756_v53 = vpop.eup %1755 }
 0x5b8   :  { %484 = vrot.lane.b32.xlu0 %v1756_v53, %s1851_s29  ;;  %v1758_v54 = vpop.eup %1757  ;;  %v479_v63 = vadd.f32 1.0, %v1756_v53 }
 0x5b9   :  { %v478_v55 = vadd.f32 1.0, %v1758_v54 }
 0x5ba   :  { %v481_v1 = vmul.f32 0.5, %v479_v63 }
 0x5bb   :  { %v480_v56 = vmul.f32 0.5, %v478_v55 }
 0x5bd   :  { %v482_v59 = vmul.f32 %v480_v56, %v417_v34 }
 0x62a   :  { %v485_v57 = vpop.permute.xlu0 %484 }
 0x62b   :  { %v487_v58 = vmul.f32 %v485_v57, %v480_v56 }
 0x62d   :  { %489 = vrot.lane.b32.xlu1 %v487_v58, %s1851_s29 }
 0x69f   :  { %v490_v60 = vpop.permute.xlu1 %489 }
 0x6a0   :  { %v492_v61 = vadd.f32 %v490_v60, %v482_v59 }
 0x6a2   :  { %1759 = vtanh.f32 %v492_v61 }
 0x6ac   :  { %v1760_v62 = vpop.eup %1759 }
 0x6ad   :  { %495 = vrot.lane.b32.xlu0 %v1760_v62, %s1851_s29 }
 0x71f   :  { %v496_v2 = vpop.permute.xlu0 %495 }
 0x720   :  { %v498_v3 = vmul.f32 %v496_v2, %v481_v1 }
 0x722   :  { %v504_v6 = vpack.c.bf16 %v498_v3, %v498_v3 }
 0x724   :  { %1535 = vmatmul.mubr.msk.bf16.vlgmr.msra.gmra.mrb[16].mxu1 %vm279_vm1, %v504_v6  ;;  %v194_v6 = vadd.f32 %v1986_v21, %v1994_v30 }
 0x725   :  { %659 = vmatpush1.bf16.msra.mxu1 %v1918_v5  ;;  %690 = vmatprep.mubr.bf16.mxu1 %v1850_v16 }
 0x726   :  { %660 = vmatprep.subr.bf16.mxu1 %v1925_v7 }
 0x729   :  { %661 = vmatpush1.bf16.msra.mxu1 %v1929_v8 }
 0x72a   :  { %662 = vmatprep.subr.bf16.mxu1 %v1932_v9 }
 0x72d   :  { %663 = vmatpush1.bf16.msra.mxu1 %v1944_v12 }
 0x72e   :  { %664 = vmatprep.subr.bf16.mxu1 %v1947_v13 }
 0x731   :  { %665 = vmatpush1.bf16.msra.mxu1 %v1959_v15 }
 0x732   :  { %808 = vmatprep.subr.bf16.mxu1 %v1916_v4 }
 0x7f7   :  { %v542_v14 = vpop.f32.mrb[16].mxu1 }
 0x7f8   :  { %v549_v17 = vadd.f32 %v542_v14, %v182_v10  ;;  %v544_v20 = vpop.f32.mrb[17].mxu1 }
 0x7f9   :  { %v550_v23 = vadd.f32 %v544_v20, %v184_v11  ;;  %v546_v24 = vpop.f32.mrb[18].mxu1 }
 0x7fa   :  { %v547_v25 = vpop.f32.mrb[19].mxu1 }
 0x7fb   :  { %1761 = vtanh.f32 %v550_v23 }
 0x7fc   :  { %1763 = vtanh.f32 %v549_v17 }
 0x805   :  { %v1762_v26 = vpop.eup %1761 }
 0x806   :  { %559 = vrot.lane.b32.xlu1 %v1762_v26, %s1851_s29  ;;  %v1764_v27 = vpop.eup %1763  ;;  %v554_v41 = vadd.f32 1.0, %v1762_v26 }
 0x807   :  { %v553_v34 = vadd.f32 1.0, %v1764_v27 }
 0x808   :  { %v556_v42 = vmul.f32 0.5, %v554_v41 }
 0x809   :  { %v555_v35 = vmul.f32 0.5, %v553_v34 }
 0x80b   :  { %v557_v37 = vmul.f32 %v555_v35, %v492_v61 }
 0x878   :  { %v560_v36 = vpop.permute.xlu1 %559 }
 0x879   :  { %v562_v4 = vmul.f32 %v560_v36, %v555_v35  ;;  %v200_v36 = vadd.f32 %v1990_v28, %v1994_v30 }
 0x87b   :  { %564 = vrot.lane.b32.xlu0 %v562_v4, %s1851_s29  ;;  %v202_v4 = vadd.f32 %v1992_v29, %v1996_v31 }
 0x8ed   :  { %v565_v38 = vpop.permute.xlu0 %564 }
 0x8ee   :  { %v567_v39 = vadd.f32 %v565_v38, %v557_v37 }
 0x8f0   :  { %1765 = vtanh.f32 %v567_v39 }
 0x8fa   :  { %v1766_v40 = vpop.eup %1765 }
 0x8fb   :  { %570 = vrot.lane.b32.xlu1 %v1766_v40, %s1851_s29 }
 0x96d   :  { %v571_v43 = vpop.permute.xlu1 %570 }
 0x96e   :  { %v573_v44 = vmul.f32 %v571_v43, %v556_v42 }
 0x970   :  { %v579_v45 = vpack.c.bf16 %v573_v44, %v573_v44 }
 0x972   :  { %1536 = vmatmul.mubr.msk.bf16.vlgmr.msra.gmra.mrb[12].mxu0 %vm279_vm1, %v579_v45 }
 0x973   :  { %734 = vmatpush1.bf16.msra.mxu0 %v1918_v5  ;;  %765 = vmatprep.mubr.bf16.mxu0 %v1850_v16 }
 0x974   :  { %735 = vmatprep.subr.bf16.mxu0 %v1925_v7 }
 0x977   :  { %736 = vmatpush1.bf16.msra.mxu0 %v1929_v8 }
 0x978   :  { %737 = vmatprep.subr.bf16.mxu0 %v1932_v9 }
 0x97b   :  { %738 = vmatpush1.bf16.msra.mxu0 %v1944_v12 }
 0x97c   :  { %739 = vmatprep.subr.bf16.mxu0 %v1947_v13 }
 0x97f   :  { %740 = vmatpush1.bf16.msra.mxu0 %v1959_v15 }
 0xa45   :  { %v617_v48 = vpop.f32.mrb[12].mxu0 }
 0xa46   :  { %v624_v49 = vadd.f32 %v617_v48, %v188_v46  ;;  %v619_v50 = vpop.f32.mrb[13].mxu0 }
 0xa47   :  { %v625_v51 = vadd.f32 %v619_v50, %v190_v47  ;;  %v621_v52 = vpop.f32.mrb[14].mxu0 }
 0xa48   :  { %v622_v53 = vpop.f32.mrb[15].mxu0 }
 0xa49   :  { %1767 = vtanh.f32 %v625_v51 }
 0xa4a   :  { %1769 = vtanh.f32 %v624_v49 }
 0xa53   :  { %v1768_v54 = vpop.eup %1767 }
 0xa54   :  { %634 = vrot.lane.b32.xlu0 %v1768_v54, %s1851_s29  ;;  %v1770_v55 = vpop.eup %1769  ;;  %v629_v62 = vadd.f32 1.0, %v1768_v54 }
 0xa55   :  { %v628_v56 = vadd.f32 1.0, %v1770_v55 }
 0xa56   :  { %v631_v63 = vmul.f32 0.5, %v629_v62 }
 0xa57   :  { %v630_v57 = vmul.f32 0.5, %v628_v56  ;;  %v206_v56 = vadd.f32 %v1998_v32, %v1994_v30 }
 0xa59   :  { %v632_v18 = vmul.f32 %v630_v57, %v567_v39 }
 0xac6   :  { %v635_v58 = vpop.permute.xlu0 %634 }
 0xac7   :  { %v637_v59 = vmul.f32 %v635_v58, %v630_v57  ;;  %v208_v57 = vadd.f32 %v2000_v33, %v1996_v31 }
 0xac9   :  { %639 = vrot.lane.b32.xlu1 %v637_v59, %s1851_s29 }
 0xb3b   :  { %v640_v19 = vpop.permute.xlu1 %639 }
 0xb3c   :  { %v642_v60 = vadd.f32 %v640_v19, %v632_v18 }
 0xb3e   :  { %1771 = vtanh.f32 %v642_v60 }
 0xb48   :  { %v1772_v61 = vpop.eup %1771 }
 0xb49   :  { %645 = vrot.lane.b32.xlu0 %v1772_v61, %s1851_s29 }
 0xbbb   :  { %v646_v1 = vpop.permute.xlu0 %645 }
 0xbbc   :  { %v648_v2 = vmul.f32 %v646_v1, %v631_v63 }
 0xbbe   :  { %v654_v3 = vpack.c.bf16 %v648_v2, %v648_v2 }
 0xbc0   :  { %1537 = vmatmul.mubr.msk.bf16.vlgmr.msra.gmra.mrb[20].mxu1 %vm279_vm1, %v654_v3 }
 0xbc1   :  { %809 = vmatpush1.bf16.msra.mxu1 %v1918_v5  ;;  %840 = vmatprep.mubr.bf16.mxu1 %v1850_v16  ;;  %v196_v5 = vadd.f32 %v1988_v22, %v1996_v31 }
 0xbc2   :  { %810 = vmatprep.subr.bf16.mxu1 %v1925_v7 }
 0xbc5   :  { %811 = vmatpush1.bf16.msra.mxu1 %v1929_v8 }
 0xbc6   :  { %812 = vmatprep.subr.bf16.mxu1 %v1932_v9 }
 0xbc9   :  { %813 = vmatpush1.bf16.msra.mxu1 %v1944_v12 }
 0xbca   :  { %814 = vmatprep.subr.bf16.mxu1 %v1947_v13 }
 0xbcd   :  { %815 = vmatpush1.bf16.msra.mxu1 %v1959_v15 }
 0xbce   :  { %1591 = vmatprep.subr.mxu1 %v1849_v0 }
 0xc93   :  { %v692_v16 = vpop.f32.mrb[20].mxu1 }
 0xc94   :  { %v699_v7 = vadd.f32 %v692_v16, %v194_v6  ;;  %v694_v10 = vpop.f32.mrb[21].mxu1  ;;  %v924_v16 = vld [vmem:[%s2270_s1] sm:$0xff] }
 0xc95   :  { %v700_v8 = vadd.f32 %v694_v10, %v196_v5  ;;  %v696_v11 = vpop.f32.mrb[22].mxu1  ;;  %v925_v5 = vld [vmem:[%s2273_s4 + $0x10] sm:$0x3] }
 0xc96   :  { %v697_v9 = vpop.f32.mrb[23].mxu1 }
 0xc97   :  { %1773 = vtanh.f32 %v700_v8 }
 0xc98   :  { %1775 = vtanh.f32 %v699_v7 }
 0xca1   :  { %v1774_v12 = vpop.eup %1773 }
 0xca2   :  { %709 = vrot.lane.b32.xlu1 %v1774_v12, %s1851_s29  ;;  %v1776_v13 = vpop.eup %1775  ;;  %v704_v25 = vadd.f32 1.0, %v1774_v12 }
 0xca3   :  { %v703_v15 = vadd.f32 1.0, %v1776_v13 }
 0xca4   :  { %v706_v26 = vmul.f32 0.5, %v704_v25  ;;  %v1854_v25 = vmov 0.0|0.0  }
 0xca5   :  { %v705_v14 = vmul.f32 0.5, %v703_v15  ;;  %1672 = vmatprep.subr.bf16.mxu0 %v1854_v25 }
 0xca7   :  { %v707_v21 = vmul.f32 %v705_v14, %v642_v60 }
 0xd14   :  { %v710_v17 = vpop.permute.xlu1 %709 }
 0xd15   :  { %v712_v20 = vmul.f32 %v710_v17, %v705_v14 }
 0xd17   :  { %714 = vrot.lane.b32.xlu0 %v712_v20, %s1851_s29 }
 0xd89   :  { %v715_v22 = vpop.permute.xlu0 %714 }
 0xd8a   :  { %v717_v23 = vadd.f32 %v715_v22, %v707_v21  ;;  %v927_v21 = vld [vmem:[%s2273_s4 + $0x20] sm:$0xff]  ;;  %v928_v22 = vld [vmem:[%s2273_s4 + $0x28] sm:$0xff] }
 0xd8c   :  { %1777 = vtanh.f32 %v717_v23 }
 0xd96   :  { %v1778_v24 = vpop.eup %1777 }
 0xd97   :  { %720 = vrot.lane.b32.xlu1 %v1778_v24, %s1851_s29 }
 0xe09   :  { %v721_v27 = vpop.permute.xlu1 %720 }
 0xe0a   :  { %v723_v34 = vmul.f32 %v721_v27, %v706_v26  ;;  %v1673_v26 = vpack.c.bf16 %v928_v22, %v927_v21  ;;  %v1418_v21 = vld [vmem:[%s2273_s4 + $0xc8] sm:$0xff]  ;;  %v1419_v22 = vld [vmem:[%s2273_s4 + $0xd0] sm:$0xff] }
 0xe0c   :  { %v729_v35 = vpack.c.bf16 %v723_v34, %v723_v34 }
 0xe0e   :  { %1538 = vmatmul.mubr.msk.bf16.vlgmr.msra.gmra.mrb[16].mxu0 %vm279_vm1, %v729_v35 }
 0xe0f   :  { %1600 = vmatprep.mubr.msk.f32.mxu0 %vm1852_vm4, %v1849_v0  ;;  %1674 = vmatpush3.bf16.msra.mxu0 %v1673_v26  ;;  %v1421_v26 = vld [vmem:[%s2273_s4 + $0xe0] sm:$0xff] }
 0xe10   :  { %1675 = vmatprep.subr.bf16.mxu0 %v1854_v25 }
 0xee1   :  { %v767_v37 = vpop.f32.mrb[16].mxu0 }
 0xee2   :  { %v774_v38 = vadd.f32 %v767_v37, %v200_v36  ;;  %v769_v39 = vpop.f32.mrb[17].mxu0 }
 0xee3   :  { %v775_v40 = vadd.f32 %v769_v39, %v202_v4  ;;  %v771_v41 = vpop.f32.mrb[18].mxu0 }
 0xee4   :  { %v772_v42 = vpop.f32.mrb[19].mxu0 }
 0xee5   :  { %1779 = vtanh.f32 %v775_v40  ;;  %v1092_v42 = vld [vmem:[%s2273_s4 + $0x38] sm:$0xff] }
 0xee6   :  { %1781 = vtanh.f32 %v774_v38 }
 0xeef   :  { %v1780_v43 = vpop.eup %1779 }
 0xef0   :  { %784 = vrot.lane.b32.xlu0 %v1780_v43, %s1851_s29  ;;  %v1782_v44 = vpop.eup %1781  ;;  %v779_v51 = vadd.f32 1.0, %v1780_v43  ;;  %v1093_v43 = vld [vmem:[%s2273_s4 + $0x40] sm:$0xff] }
 0xef1   :  { %v778_v45 = vadd.f32 1.0, %v1782_v44  ;;  %v1682_v44 = vpack.c.bf16 %v1093_v43, %v1092_v42 }
 0xef2   :  { %v781_v52 = vmul.f32 0.5, %v779_v51 }
 0xef3   :  { %v780_v46 = vmul.f32 0.5, %v778_v45  ;;  %v1094_v45 = vld [vmem:[%s2273_s4 + $0x48] sm:$0xff] }
 0xef5   :  { %v782_v28 = vmul.f32 %v780_v46, %v717_v23  ;;  %v1542_v23 = vld [vmem:[%s2273_s4 + $0x18] ss:$0 sm:$0xff] }
 0xf62   :  { %v785_v47 = vpop.permute.xlu0 %784 }
 0xf63   :  { %v787_v48 = vmul.f32 %v785_v47, %v780_v46  ;;  %v1095_v46 = vld [vmem:[%s2273_s4 + $0x50] sm:$0xff] }
 0xf64   :  { %v1685_v47 = vpack.c.bf16 %v1095_v46, %v1094_v45 }
 0xf65   :  { %789 = vrot.lane.b32.xlu1 %v787_v48, %s1851_s29  ;;  %v1096_v48 = vld [vmem:[%s2273_s4 + $0x58] sm:$0xff] }
 0xfd7   :  { %v790_v29 = vpop.permute.xlu1 %789 }
 0xfd8   :  { %v792_v49 = vadd.f32 %v790_v29, %v782_v28  ;;  %v1097_v28 = vld [vmem:[%s2273_s4 + $0x60] sm:$0xff]  ;;  %v1098_v29 = vld [vmem:[%s2273_s4 + $0x68] sm:$0xff] }
 0xfda   :  { %1783 = vtanh.f32 %v792_v49 }
 0xfe4   :  { %v1784_v50 = vpop.eup %1783 }
 0xfe5   :  { %795 = vrot.lane.b32.xlu0 %v1784_v50, %s1851_s29  ;;  %v1099_v50 = vld [vmem:[%s2273_s4 + $0x70] sm:$0xff] }
 0xfe6   :  { %v1679_v51 = vpack.c.bf16 %v1099_v50, %v1098_v29 }
0x1057   :  { %v796_v53 = vpop.permute.xlu0 %795 }
0x1058   :  { %v798_v54 = vmul.f32 %v796_v53, %v781_v52 }
0x105a   :  { %v804_v55 = vpack.c.bf16 %v798_v54, %v798_v54 }
0x105c   :  { %1539 = vmatmul.mubr.msk.bf16.vlgmr.msra.gmra.mrb[24].mxu1 %vm279_vm1, %v804_v55 }
0x105d   :  { %1592 = vmatpush3.msk.msra.mxu1 %vm938_vm2, %v925_v5  ;;  %1593 = vmatprep.mubr.msk.f32.mxu1 %vm1852_vm4, %v1849_v0  ;;  %v1545_v5 = vld [vmem:[%s2273_s4 + $0x30] ss:$0 sm:$0xff] }
0x105e   :  { %1681 = vmatprep.subr.bf16.mxu1 %v1854_v25 }
0x1064   :  { %1594 = vmatmul.mubr.msk.f32.vlgmr.msra.gmra.mrb[28].mxu1 %vm934_vm3, %v924_v16 }
0x1065   :  { %1622 = vmatprep.mubr.msk.f32.mxu1 %vm1852_vm4, %v1849_v0  ;;  %1683 = vmatpush3.bf16.msra.mxu1 %v1682_v44 }
0x1066   :  { %1684 = vmatprep.subr.bf16.mxu1 %v1854_v25 }
0x1069   :  { %1686 = vmatpush3.bf16.msra.mxu1 %v1685_v47 }
0x106a   :  { %1687 = vmatprep.subr.bf16.mxu1 %v1854_v25 }
0x112f   :  { %v842_v58 = vpop.f32.mrb[24].mxu1 }
0x1130   :  { %v849_v59 = vadd.f32 %v842_v58, %v206_v56  ;;  %v844_v18 = vpop.f32.mrb[25].mxu1  ;;  %v1540_v58 = vld [vmem:[%s2273_s4] ss:$0 sm:$0xff] }
0x1131   :  { %v850_v19 = vadd.f32 %v844_v18, %v208_v57  ;;  %v846_v60 = vpop.f32.mrb[26].mxu1  ;;  %v1541_v18 = vld [vmem:[%s2273_s4 + $0x8] ss:$0 sm:$0xff] }
0x1132   :  { %v847_v61 = vpop.f32.mrb[27].mxu1 }
0x1133   :  { %1785 = vtanh.f32 %v850_v19 }
0x1134   :  { %1787 = vtanh.f32 %v849_v59 }
0x1137   :  { %v1008_v24 = vpop.f32.mrb[28].mxu1 }
0x1138   :  { %v1009_v27 = vadd.f32 %v1542_v23, %v1008_v24  ;;  %v1595_v34 = vpop.f32.mrb[29].mxu1  ;;  %v1701_v23 = vpack.c.bf16 %v1419_v22, %v1418_v21  ;;  %v1420_v24 = vld [vmem:[%s2273_s4 + $0xd8] sm:$0xff] }
0x1139   :  { %v1422_v34 = vld [vmem:[%s2273_s4 + $0xe8] sm:$0xff] }
0x113a   :  { %v1012_v35 = vmax.f32 %v1009_v27, 0.0  ;;  %v1704_v27 = vpack.c.bf16 %v1421_v26, %v1420_v24 }
0x113c   :  { %1601 = vmatmul.mubr.msk.f32.vlgmr.msra.gmra.mrb[20].mxu0 %vm1017_vm6, %v1012_v35  ;;  %v1423_v35 = vld [vmem:[%s2273_s4 + $0xf0] sm:$0xff] }
0x113d   :  { %v1786_v62 = vpop.eup %1785  ;;  %1611 = vmatprep.mubr.msk.f32.mxu0 %vm1852_vm4, %v1849_v0 }
0x113e   :  { %859 = vrot.lane.b32.xlu1 %v1786_v62, %s1851_s29  ;;  %v1788_v63 = vpop.eup %1787  ;;  %v854_v7 = vadd.f32 1.0, %v1786_v62 }
0x113f   :  { %v853_v1 = vadd.f32 1.0, %v1788_v63 }
0x1140   :  { %v856_v10 = vmul.f32 0.5, %v854_v7  ;;  %v1100_v7 = vld [vmem:[%s2273_s4 + $0x78] sm:$0xff] }
0x1141   :  { %v855_v2 = vmul.f32 0.5, %v853_v1 }
0x1143   :  { %v857_v30 = vmul.f32 %v855_v2, %v792_v49  ;;  %v1676_v49 = vpack.c.bf16 %v1097_v28, %v1096_v48 }
0x1145   :  { %1677 = vmatpush3.bf16.msra.mxu0 %v1676_v49  ;;  %v1552_v49 = vld [vmem:[%s2273_s4 + $0x90] ss:$0 sm:$0xff] }
0x1146   :  { %1678 = vmatprep.subr.bf16.mxu0 %v1854_v25 }
0x1149   :  { %1680 = vmatpush3.bf16.msra.mxu0 %v1679_v51 }
0x114a   :  { %1625 = vmatprep.subr.mxu0 %v1849_v0 }
0x11b0   :  { %v860_v3 = vpop.permute.xlu1 %859 }
0x11b1   :  { %v862_v6 = vmul.f32 %v860_v3, %v855_v2  ;;  %v1101_v3 = vld [vmem:[%s2273_s4 + $0x80] sm:$0xff] }
0x11b3   :  { %864 = vrot.lane.b32.xlu0 %v862_v6, %s1851_s29  ;;  %v1102_v6 = vld [vmem:[%s2273_s4 + $0x88] sm:$0x3f] }
0x120f   :  { %v1087_v55 = vpop.f32.mrb[20].mxu0 }
0x1210   :  { %v1602_v56 = vpop.f32.mrb[21].mxu0 }
0x1225   :  { %v865_v31 = vpop.permute.xlu0 %864 }
0x1226   :  { %v867_v32 = vadd.f32 %v865_v31, %v857_v30  ;;  %v1688_v31 = vpack.c.bf16 %v1102_v6, %v1101_v3 }
0x1228   :  { %1789 = vtanh.f32 %v867_v32 }
0x1232   :  { %v1790_v33 = vpop.eup %1789 }
0x1233   :  { %870 = vrot.lane.b32.xlu1 %v1790_v33, %s1851_s29 }
0x12a5   :  { %v871_v8 = vpop.permute.xlu1 %870 }
0x12a6   :  { %v873_v11 = vmul.f32 %v871_v8, %v856_v10 }
0x12a8   :  { %902 = vrot.lane.b32.xlu0 %v873_v11, %s1853_s14  ;;  %v877_v20 = vsel %vm876_vm5, %v873_v11, 0.0 }
0x131a   :  { %v903_v9 = vpop.permute.xlu0 %902 }
0x131b   :  { %v905_v12 = vsel %vm876_vm5, %v903_v9, 0.0  ;;  %v1413_v9 = vld [vmem:[%s2273_s4 + $0xa0] sm:$0xff] }
0x131c   :  { %906 = vadd.xlane.f32.xlu1 %v905_v12  ;;  %v1414_v12 = vld [vmem:[%s2273_s4 + $0xa8] sm:$0xff] }
0x13a9   :  { %v907_v13 = vpop.xlane.xlu1 %906 }
0x13aa   :  { %v908_v15 = vmul.f32 0.03125, %v907_v13 }
0x13ac   :  { %v909_v14 = vsub.f32 %v873_v11, %v908_v15  ;;  %v1415_v15 = vld [vmem:[%s2273_s4 + $0xb0] sm:$0xff] }
0x13ae   :  { %v910_v17 = vmul.f32 %v909_v14, %v909_v14 }
0x13b0   :  { %912 = vrot.lane.b32.xlu0 %v910_v17, %s1853_s14  ;;  %v1417_v17 = vld [vmem:[%s2273_s4 + $0xc0] sm:$0xff] }
0x13cf   :  { %878 = vadd.xlane.f32.xlu0 %v877_v20 }
0x1422   :  { %v913_v36 = vpop.permute.xlu0 %912 }
0x1423   :  { %v915_v4 = vsel %vm876_vm5, %v913_v36, 0.0  ;;  %v1707_v36 = vpack.c.bf16 %v1423_v35, %v1422_v34 }
0x1424   :  { %916 = vadd.xlane.f32.xlu1 %v915_v4  ;;  %v1424_v4 = vld [vmem:[%s2273_s4 + $0xf8] sm:$0xff] }
0x145c   :  { %v879_v37 = vpop.xlane.xlu0 %878 }
0x145d   :  { %v881_v38 = vmul.f32 0.03125, %v879_v37  ;;  %v1425_v37 = vld [vmem:[%s2273_s4 + $0x100] sm:$0xff] }
0x145f   :  { %v882_v39 = vsub.f32 %v873_v11, %v881_v38  ;;  %v1412_v11 = vld [vmem:[%s2273_s4 + $0x98] sm:$0xff]  ;;  %v1710_v38 = vpack.c.bf16 %v1425_v37, %v1424_v4 }
0x1460   :  { %v1692_v13 = vpack.c.bf16 %v1413_v9, %v1412_v11 }
0x1461   :  { %v883_v40 = vmul.f32 %v882_v39, %v882_v39 }
0x1463   :  { %v884_v41 = vsel %vm876_vm5, %v883_v40, 0.0  ;;  %v1427_v40 = vld [vmem:[%s2273_s4 + $0x110] sm:$0xff] }
0x1464   :  { %885 = vadd.xlane.f32.xlu0 %v884_v41 }
0x147a   :  { %1326 = vrot.lane.b32.xlu0 %v924_v16, %s1855_s19  ;;  %v1088_v16 = vadd.f32 %v1545_v5, %v1087_v55 }
0x147c   :  { %v1091_v8 = vmax.f32 %v1088_v16, 0.0 }
0x14b1   :  { %v917_v52 = vpop.xlane.xlu1 %916 }
0x14b2   :  { %v918_v53 = vmul.f32 0.03125, %v917_v52 }
0x14b4   :  { %v919_v54 = vadd.f32 1e-05, %v918_v53  ;;  %v1553_v53 = vld [vmem:[%s2273_s4 + $0x118] ss:$0 sm:$0xff] }
0x14b6   :  { %1791 = vrsqrt.f32 %v919_v54 }
0x14c0   :  { %v1792_v57 = vpop.eup %1791 }
0x14c1   :  { %v921_v59 = vmul.f32 %v1792_v57, %v909_v14  ;;  %v1695_v14 = vpack.c.bf16 %v1415_v15, %v1414_v12 }
0x14c3   :  { %v922_v19 = vmul.f32 %v1540_v58, %v921_v59 }
0x14c5   :  { %v923_v60 = vadd.f32 %v1541_v18, %v922_v19 }
0x14c7   :  { %1105 = vrot.lane.b32.xlu1 %v923_v60, %s1853_s14 }
0x14f1   :  { %v886_v61 = vpop.xlane.xlu0 %885 }
0x14f2   :  { %v887_v62 = vmul.f32 0.03125, %v886_v61 }
0x14f4   :  { %v888_v63 = vadd.f32 1e-05, %v887_v62 }
0x14f5   :  { %v1327_v33 = vpop.permute.xlu0 %1326 }
0x14f6   :  { %1793 = vrsqrt.f32 %v888_v63 }
0x1500   :  { %v1794_v1 = vpop.eup %1793 }
0x1501   :  { %v890_v2 = vmul.f32 %v1794_v1, %v882_v39  ;;  %v1426_v39 = vld [vmem:[%s2273_s4 + $0x108] sm:$0xff] }
0x1502   :  { %v1713_v41 = vpack.c.bf16 %v1427_v40, %v1426_v39 }
0x1503   :  { %v895_v30 = vmul.f32 %v1540_v58, %v890_v2 }
0x1505   :  { %v900_v32 = vadd.f32 %v1541_v18, %v895_v30 }
0x1507   :  { %1623 = vmatmul.mubr.msk.f32.vlgmr.msra.gmra.mrb[30].mxu1 %vm876_vm5, %v900_v32 }
0x1508   :  { %1690 = vmatpush3.bf16.msk.msra.mxu1 %vm1689_vm9, %v1688_v31  ;;  %1634 = vmatprep.mubr.msk.f32.mxu1 %vm1852_vm4, %v1849_v0 }
0x150b   :  { %1635 = vmatmul.mubr.msk.f32.vlgmr.msra.gmra.mrb[32].mxu1 %vm1328_vm10, %v1327_v33 }
0x1539   :  { %v1106_v10 = vpop.permute.xlu1 %1105 }
0x153a   :  { %1612 = vmatmul.mubr.msk.f32.vlgmr.msra.gmra.mrb[22].mxu0 %vm876_vm5, %v1106_v10 }
0x153b   :  { %1626 = vmatpush3.msra.mxu0 %v1100_v7  ;;  %1627 = vmatprep.mubr.msk.f32.mxu0 %vm1852_vm4, %v1849_v0 }
0x153c   :  { %1691 = vmatprep.subr.bf16.mxu0 %v1854_v25 }
0x153e   :  { %1628 = vmatmul.mubr.msk.f32.vlgmr.msra.gmra.mrb[24].mxu0 %vm72_vm0, %v1091_v8 }
0x153f   :  { %1669 = vmatprep.mubr.msk.f32.mxu0 %vm1852_vm4, %v1849_v0  ;;  %1693 = vmatpush3.bf16.msra.mxu0 %v1692_v13  ;;  %v1416_v0 = vld [vmem:[%s2273_s4 + $0xb8] sm:$0xff] }
0x1540   :  { %1694 = vmatprep.subr.bf16.mxu0 %v1854_v25  ;;  %v1698_v20 = vpack.c.bf16 %v1417_v17, %v1416_v0 }
0x1543   :  { %1696 = vmatpush3.bf16.msra.mxu0 %v1695_v14 }
0x1544   :  { %1697 = vmatprep.subr.bf16.mxu0 %v1854_v25 }
0x1547   :  { %1699 = vmatpush3.bf16.msra.mxu0 %v1698_v20 }
0x1548   :  { %1700 = vmatprep.subr.bf16.mxu0 %v1854_v25 }
0x154b   :  { %1702 = vmatpush3.bf16.msra.mxu0 %v1701_v23 }
0x154c   :  { %1703 = vmatprep.subr.bf16.mxu0 %v1854_v25 }
0x154f   :  { %1705 = vmatpush3.bf16.msra.mxu0 %v1704_v27 }
0x1550   :  { %1706 = vmatprep.subr.bf16.mxu0 %v1854_v25 }
0x1553   :  { %1708 = vmatpush3.bf16.msra.mxu0 %v1707_v36 }
0x1554   :  { %1709 = vmatprep.subr.bf16.mxu0 %v1854_v25 }
0x1557   :  { %1711 = vmatpush3.bf16.msra.mxu0 %v1710_v38 }
0x1558   :  { %1712 = vmatprep.subr.bf16.mxu0 %v1854_v25 }
0x155b   :  { %1714 = vmatpush3.bf16.msra.mxu0 %v1713_v41 }
0x15da   :  { %v1248_v42 = vpop.f32.mrb[30].mxu1 }
0x15db   :  { %v1624_v43 = vpop.f32.mrb[31].mxu1 }
0x15de   :  { %v1401_v44 = vpop.f32.mrb[32].mxu1 }
0x15df   :  { %v1636_v45 = vpop.f32.mrb[33].mxu1 }
0x160d   :  { %v1175_v46 = vpop.f32.mrb[22].mxu0 }
0x160e   :  { %v1249_v47 = vadd.f32 %v1248_v42, %v1175_v46  ;;  %v1613_v48 = vpop.f32.mrb[23].mxu0 }
0x1611   :  { %v1321_v28 = vpop.f32.mrb[24].mxu0 }
0x1612   :  { %v1325_v29 = vadd.f32 %v1321_v28, %v1249_v47  ;;  %v1629_v25 = vpop.f32.mrb[25].mxu0 }
0x1614   :  { %v1405_v50 = vadd.f32 %v1401_v44, %v1325_v29 }
0x1616   :  { %v1410_v51 = vadd.f32 %v1552_v49, %v1405_v50 }
0x1618   :  { %v1411_v52 = vmax.f32 %v1410_v51, 0.0 }
0x161a   :  { %1670 = vmatmul.mubr.f32.vlgmr.msra.gmra.mrb[26].mxu0 %v1411_v52 }
0x16ed   :  { %v1499_v54 = vpop.f32.mrb[26].mxu0 }
0x16ee   :  { %v1500_v55 = vadd.f32 %v1553_v53, %v1499_v54  ;;  %v1671_v56 = vpop.f32.mrb[27].mxu0 }
0x16f0   :  { %1503 = vst [vmem:[%s2274_s5] sm:$0xff] %v1500_v55 }
0x16f1   :  { %1508 = vsyncpa [#allocation4], 1 }
0x16f2   :  { %1509 = vsyncpa [#allocation6], 1 }

</bundles_post_ra>
